<compile_context>
chip_gen: v7x
topology: tpu7x:2x2x1
jax: 0.10.0
libtpu: 0.0.40
codegen_flags: <defaults>
</compile_context>

<pallas_src>
import functools

import jax
import jax.numpy as jnp
from jax.experimental import pallas as pl
from jax.experimental.pallas import tpu as pltpu

EPS = 1e-5
NEG_INF = -1e30                       # large-negative mask (avoids -inf NaN risk)
MATMUL_DTYPE = jnp.bfloat16           # MXU operand dtype (f32 accumulation)


# ----------------------------------------------------------------------------
# helpers
# ----------------------------------------------------------------------------
def _pick_tile(dim, candidates):
    """Largest candidate that evenly divides `dim`, else the full dim."""
    for c in candidates:
        if dim >= c and dim % c == 0:
            return c
    return dim


# ----------------------------------------------------------------------------
# Pallas kernels
# ----------------------------------------------------------------------------
def block_kernel(x_ref, ln1s_ref, ln1b_ref, ln2s_ref, ln2b_ref,
                 wqkv_ref, wo_ref, bo_ref, o_ref, *, num_heads):
    """One full TransformerBlock for one batch element (block = (1, S, E)).

    Mirrors the PyTorch source: attention is applied twice with the same
    weights; FeedForward/GELU are constructed there but never called.
    Dropout is identity (drop_rate = 0.0 / eval semantics).
    """
    x = x_ref[0].astype(jnp.float32)                 # (S, E)
    S, E = x.shape
    hd = E // num_heads
    scale = 1.0 / (hd ** 0.5)

    ln1s, ln1b = ln1s_ref[...], ln1b_ref[...]        # (1, E) f32
    ln2s, ln2b = ln2s_ref[...], ln2b_ref[...]
    wqkv = wqkv_ref[...]                             # (E, 3E) bf16
    wo = wo_ref[...]                                 # (E, E)  bf16
    bo = bo_ref[...]                                 # (1, E)  f32

    row = jax.lax.broadcasted_iota(jnp.int32, (S, S), 0)
    col = jax.lax.broadcasted_iota(jnp.int32, (S, S), 1)
    causal = col > row                               # triu(diag=1)

    def layer_norm(h, sc, sh):                       # f32 VPU math, rsqrt on EUP
        mean = jnp.mean(h, axis=-1, keepdims=True)
        var = jnp.mean((h - mean) ** 2, axis=-1, keepdims=True)
        return sc * ((h - mean) * jax.lax.rsqrt(var + EPS)) + sh

    def attention(n):
        nc = n.astype(wqkv.dtype)
        # fused QKV projection: one MXU op, N = 3E
        qkv = jnp.dot(nc, wqkv, preferred_element_type=jnp.float32)  # (S, 3E)
        acc = jnp.zeros((S, E), jnp.float32)
        for h in range(num_heads):                   # bounded live state per head
            qh = qkv[:, h * hd:(h + 1) * hd]
            kh = qkv[:, E + h * hd:E + (h + 1) * hd]
            vh = qkv[:, 2 * E + h * hd:2 * E + (h + 1) * hd]
            # contract on head_dim of both operands -> no kh.T transpose
            s = jax.lax.dot_general(
                qh, kh, (((1,), (1,)), ((), ())),
                preferred_element_type=jnp.float32) * scale
            s = jnp.where(causal, NEG_INF, s)
            m = jnp.max(s, axis=-1, keepdims=True)
            p = jnp.exp(s - m)
            denom = jnp.sum(p, axis=-1, keepdims=True)
            w = p * pl.reciprocal(denom, approx=True)       # divide on EUP slot
            ctx_h = jnp.dot(w.astype(MATMUL_DTYPE), vh.astype(MATMUL_DTYPE),
                            preferred_element_type=jnp.float32)
            # output projection distributes over heads -> accumulate, no concat
            acc = acc + jnp.dot(ctx_h.astype(wo.dtype),
                                wo[h * hd:(h + 1) * hd, :],
                                preferred_element_type=jnp.float32)
        return acc + bo

    # --- as in the PyTorch TransformerBlock.forward: att applied twice -------
    h1 = x + attention(layer_norm(x, ln1s, ln1b))
    h2 = h1 + attention(layer_norm(h1, ln2s, ln2b))
    o_ref[0] = h2.astype(o_ref.dtype)


def layernorm_kernel(x_ref, scale_ref, shift_ref, o_ref):
    x = x_ref[...]                                   # (rows, E) f32
    mean = jnp.mean(x, axis=-1, keepdims=True)
    var = jnp.mean((x - mean) ** 2, axis=-1, keepdims=True)   # unbiased=False
    o_ref[...] = scale_ref[...] * ((x - mean) * jax.lax.rsqrt(var + EPS)) \
        + shift_ref[...]


def matmul_acc_kernel(x_ref, w_ref, o_ref, acc_ref):
    @pl.when(pl.program_id(2) == 0)
    def _():
        acc_ref[...] = jnp.zeros_like(acc_ref)

    acc_ref[...] += jnp.dot(x_ref[...].astype(w_ref.dtype), w_ref[...],
                            preferred_element_type=jnp.float32)

    @pl.when(pl.program_id(2) == pl.num_programs(2) - 1)
    def _():
        o_ref[...] = acc_ref[...].astype(o_ref.dtype)


# ----------------------------------------------------------------------------
# pallas_call wrappers
# ----------------------------------------------------------------------------
def transformer_block(x, layer, num_heads):
    B, S, E = x.shape
    kernel = functools.partial(block_kernel, num_heads=num_heads)
    grid_spec = pltpu.PrefetchScalarGridSpec(
        num_scalar_prefetch=0,
        grid=(B,),
        in_specs=[
            pl.BlockSpec((1, S, E), lambda b: (b, 0, 0)),
            pl.BlockSpec((1, E), lambda b: (0, 0)),
            pl.BlockSpec((1, E), lambda b: (0, 0)),
            pl.BlockSpec((1, E), lambda b: (0, 0)),
            pl.BlockSpec((1, E), lambda b: (0, 0)),
            pl.BlockSpec((E, 3 * E), lambda b: (0, 0)),
            pl.BlockSpec((E, E), lambda b: (0, 0)),
            pl.BlockSpec((1, E), lambda b: (0, 0)),
        ],
        out_specs=pl.BlockSpec((1, S, E), lambda b: (b, 0, 0)),
    )
    return pl.pallas_call(
        kernel,
        grid_spec=grid_spec,
        out_shape=jax.ShapeDtypeStruct((B, S, E), jnp.float32),
        compiler_params=pltpu.CompilerParams(
            dimension_semantics=("parallel",)),
    )(x, layer["ln1_scale"], layer["ln1_shift"],
      layer["ln2_scale"], layer["ln2_shift"],
      layer["wqkv"], layer["wo"], layer["bo"])


def layernorm(x2d, scale, shift):
    M, E = x2d.shape
    tr = _pick_tile(M, (1024, 512, 256, 128, 64, 32, 16, 8))
    return pl.pallas_call(
        layernorm_kernel,
        grid_spec=pltpu.PrefetchScalarGridSpec(
            num_scalar_prefetch=0,
            grid=(M // tr,),
            in_specs=[pl.BlockSpec((tr, E), lambda i: (i, 0)),
                      pl.BlockSpec((1, E), lambda i: (0, 0)),
                      pl.BlockSpec((1, E), lambda i: (0, 0))],
            out_specs=pl.BlockSpec((tr, E), lambda i: (i, 0))),
        out_shape=jax.ShapeDtypeStruct((M, E), jnp.float32),
        compiler_params=pltpu.CompilerParams(
            dimension_semantics=("parallel",)),
    )(x2d, scale, shift)


def linear_nobias(x2d, w):
    """Tiled x @ w with f32 accumulator (lane-dense N tiles when divisible)."""
    M, K = x2d.shape
    _, N = w.shape
    tm = _pick_tile(M, (256, 128, 64, 32, 16, 8))
    tn = _pick_tile(N, (512, 256, 128))
    tk = _pick_tile(K, (512, 256, 128))
    grid = (M // tm, N // tn, K // tk)
    return pl.pallas_call(
        matmul_acc_kernel,
        grid_spec=pltpu.PrefetchScalarGridSpec(
            num_scalar_prefetch=0,
            grid=grid,
            in_specs=[pl.BlockSpec((tm, tk), lambda i, j, k: (i, k)),
                      pl.BlockSpec((tk, tn), lambda i, j, k: (k, j))],
            out_specs=pl.BlockSpec((tm, tn), lambda i, j, k: (i, j)),
            scratch_shapes=[pltpu.VMEM((tm, tn), jnp.float32)]),
        out_shape=jax.ShapeDtypeStruct((M, N), jnp.float32),
        compiler_params=pltpu.CompilerParams(
            dimension_semantics=("parallel", "parallel", "arbitrary")),
    )(x2d, w)


# ----------------------------------------------------------------------------
# Model
# ----------------------------------------------------------------------------
def init_params(cfg, key):
    V, E, C, L = (cfg["vocab_size"], cfg["embed_dim"],
                  cfg["context_length"], cfg["n_layers"])

    def nrm(k, shape, dtype=jnp.float32):
        return (jax.random.normal(k, shape, jnp.float32) * 0.02).astype(dtype)

    keys = jax.random.split(key, 3 + L)
    params = {
        "tok_emb": nrm(keys[0], (V, E)),
        "pos_emb": nrm(keys[1], (C, E)),
        "w_out": nrm(keys[2], (E, V), MATMUL_DTYPE),       # bf16 weight, f32 acc
        "final_scale": jnp.ones((1, E), jnp.float32),
        "final_shift": jnp.zeros((1, E), jnp.float32),
        "layers": [],
    }
    for l in range(L):
        kq, kk, kv, ko, kb = jax.random.split(keys[3 + l], 5)
        wq = nrm(kq, (E, E))
        wk = nrm(kk, (E, E))
        wv = nrm(kv, (E, E))
        params["layers"].append({
            "ln1_scale": jnp.ones((1, E), jnp.float32),
            "ln1_shift": jnp.zeros((1, E), jnp.float32),
            "ln2_scale": jnp.ones((1, E), jnp.float32),
            "ln2_shift": jnp.zeros((1, E), jnp.float32),
            # fused QKV weight, stored bf16 (matmul operand dtype)
            "wqkv": jnp.concatenate([wq, wk, wv], axis=1).astype(MATMUL_DTYPE),
            "wo": nrm(ko, (E, E), MATMUL_DTYPE),
            "bo": nrm(kb, (1, E)),
        })
    return params


def gpt_forward(tokens, params, cfg):
    B, S = tokens.shape
    E, V, H = cfg["embed_dim"], cfg["vocab_size"], cfg["n_heads"]

    # Embedding gather stays in plain JAX (XLA gather); dropout is identity.
    tok_emb = jnp.take(params["tok_emb"], tokens, axis=0)        # (B, S, E)
    pos_emb = params["pos_emb"][:S]                              # (S, E)
    h = tok_emb + pos_emb[None, :, :]

    for layer in params["layers"]:
        h = transformer_block(h, layer, H)   # fused LN+attn+res (x2) per block

    h2 = layernorm(h.reshape(B * S, E),
                   params["final_scale"], params["final_shift"])
    logits = linear_nobias(h2, params["w_out"])
    return logits.reshape(B, S, V)


# ----------------------------------------------------------------------------
if __name__ == "__main__":
    cfg = {
        "vocab_size": 64,
        "context_length": 8,
        "embed_dim": 32,
        "n_heads": 4,
        "n_layers": 2,
        "drop_rate": 0.0,   # dropout is identity -> deterministic forward
    }
    key = jax.random.PRNGKey(0)
    pkey, tkey = jax.random.split(key)
    params = init_params(cfg, pkey)

    B, S = 2, 8
    tokens = jax.random.randint(tkey, (B, S), 0, cfg["vocab_size"],
                                dtype=jnp.int32)

    fwd = jax.jit(lambda t, p: gpt_forward(t, p, cfg))
    logits = jax.block_until_ready(fwd(tokens, params))
    assert logits.shape == (B, S, cfg["vocab_size"])
    assert jnp.all(jnp.isfinite(logits))
    print("KERNEL_OK")
</pallas_src>

<mosaic_0001>
module attributes {stable_mosaic.version = 11 : i64} {
  func.func @layernorm_kernel(%arg0: i32, %arg1: memref<16x32xf32, #tpu.memory_space<vmem>>, %arg2: memref<1x32xf32, #tpu.memory_space<vmem>>, %arg3: memref<1x32xf32, #tpu.memory_space<vmem>>, %arg4: memref<16x32xf32, #tpu.memory_space<vmem>>) attributes {dimension_semantics = [#tpu.dimension_semantics<parallel>], iteration_bounds = array<i64: 1>, scalar_prefetch = 0 : i64, scratch_operands = 0 : i64, tpu.core_type = #tpu.core_type<tc>, window_params = [{transform_indices = @transform_0, window_bounds = array<i64: 16, 32>}, {pipeline_mode = #tpu.pipeline_mode<synchronous>, transform_indices = @transform_1, window_bounds = array<i64: 1, 32>}, {pipeline_mode = #tpu.pipeline_mode<synchronous>, transform_indices = @transform_2, window_bounds = array<i64: 1, 32>}, {transform_indices = @transform_3, window_bounds = array<i64: 16, 32>}]} {
    %c0 = arith.constant 0 : index
    %c0_0 = arith.constant 0 : index
    %0 = vector.load %arg1[%c0, %c0_0] : memref<16x32xf32, #tpu.memory_space<vmem>>, vector<16x32xf32>
    %cst = arith.constant dense<0.000000e+00> : vector<16xf32>
    %1 = vector.multi_reduction <add>, %0, %cst [1] : vector<16x32xf32> to vector<16xf32>
    %2 = vector.shape_cast %1 : vector<16xf32> to vector<16x1xf32>
    %cst_1 = arith.constant 3.200000e+01 : f32
    %3 = vector.broadcast %cst_1 : f32 to vector<16x1xf32>
    %4 = arith.divf %2, %3 : vector<16x1xf32>
    %5 = vector.broadcast %4 : vector<16x1xf32> to vector<16x32xf32>
    %6 = arith.subf %0, %5 : vector<16x32xf32>
    %7 = arith.mulf %6, %6 : vector<16x32xf32>
    %cst_2 = arith.constant dense<0.000000e+00> : vector<16xf32>
    %8 = vector.multi_reduction <add>, %7, %cst_2 [1] : vector<16x32xf32> to vector<16xf32>
    %9 = vector.shape_cast %8 : vector<16xf32> to vector<16x1xf32>
    %cst_3 = arith.constant 3.200000e+01 : f32
    %10 = vector.broadcast %cst_3 : f32 to vector<16x1xf32>
    %11 = arith.divf %9, %10 : vector<16x1xf32>
    %c0_4 = arith.constant 0 : index
    %c0_5 = arith.constant 0 : index
    %12 = vector.load %arg2[%c0_4, %c0_5] : memref<1x32xf32, #tpu.memory_space<vmem>>, vector<1x32xf32>
    %13 = vector.broadcast %4 : vector<16x1xf32> to vector<16x32xf32>
    %14 = arith.subf %0, %13 : vector<16x32xf32>
    %cst_6 = arith.constant 9.99999974E-6 : f32
    %15 = vector.broadcast %cst_6 : f32 to vector<16x1xf32>
    %16 = arith.addf %11, %15 : vector<16x1xf32>
    %17 = math.rsqrt %16 : vector<16x1xf32>
    %18 = vector.broadcast %17 : vector<16x1xf32> to vector<16x32xf32>
    %19 = arith.mulf %14, %18 : vector<16x32xf32>
    %20 = vector.broadcast %12 : vector<1x32xf32> to vector<16x32xf32>
    %21 = arith.mulf %20, %19 : vector<16x32xf32>
    %c0_7 = arith.constant 0 : index
    %c0_8 = arith.constant 0 : index
    %22 = vector.load %arg3[%c0_7, %c0_8] : memref<1x32xf32, #tpu.memory_space<vmem>>, vector<1x32xf32>
    %23 = vector.broadcast %22 : vector<1x32xf32> to vector<16x32xf32>
    %24 = arith.addf %21, %23 : vector<16x32xf32>
    %c0_9 = arith.constant 0 : index
    %c0_10 = arith.constant 0 : index
    %25 = vector.load %arg4[%c0_9, %c0_10] : memref<16x32xf32, #tpu.memory_space<vmem>>, vector<16x32xf32>
    tpu.vector_store %arg4[%c0_9, %c0_10], %24 {strides = array<i32>} : memref<16x32xf32, #tpu.memory_space<vmem>>, vector<16x32xf32>,
    return
  }
  func.func @transform_0(%arg0: i32) -> (i32, i32) {
    %c0_i32 = arith.constant 0 : i32
    %c0_i32_0 = arith.constant 0 : i32
    return %arg0, %c0_i32 : i32, i32
  }
  func.func @transform_1(%arg0: i32) -> (i32, i32) {
    %c0_i32 = arith.constant 0 : i32
    %c0_i32_0 = arith.constant 0 : i32
    %c0_i32_1 = arith.constant 0 : i32
    return %c0_i32, %c0_i32_0 : i32, i32
  }
  func.func @transform_2(%arg0: i32) -> (i32, i32) {
    %c0_i32 = arith.constant 0 : i32
    %c0_i32_0 = arith.constant 0 : i32
    %c0_i32_1 = arith.constant 0 : i32
    return %c0_i32, %c0_i32_0 : i32, i32
  }
  func.func @transform_3(%arg0: i32) -> (i32, i32) {
    %c0_i32 = arith.constant 0 : i32
    %c0_i32_0 = arith.constant 0 : i32
    return %arg0, %c0_i32 : i32, i32
  }
}

module attributes {stable_mosaic.version = 11 : i64} {
  func.func @matmul_acc_kernel(%arg0: i32, %arg1: i32, %arg2: i32, %arg3: memref<16x32xf32, #tpu.memory_space<vmem>>, %arg4: memref<32x64xbf16, #tpu.memory_space<vmem>>, %arg5: memref<16x64xf32, #tpu.memory_space<vmem>>, %arg6: memref<16x64xf32, #tpu.memory_space<vmem>>) attributes {dimension_semantics = [#tpu.dimension_semantics<parallel>, #tpu.dimension_semantics<parallel>, #tpu.dimension_semantics<arbitrary>], iteration_bounds = array<i64: 1, 1, 1>, scalar_prefetch = 0 : i64, scratch_operands = 1 : i64, tpu.core_type = #tpu.core_type<tc>, window_params = [{transform_indices = @transform_0, window_bounds = array<i64: 16, 32>}, {transform_indices = @transform_1, window_bounds = array<i64: 32, 64>}, {transform_indices = @transform_2, window_bounds = array<i64: 16, 64>}]} {
    %c0_i32 = arith.constant 0 : i32
    %0 = arith.cmpi eq, %arg2, %c0_i32 : i32
    %1 = arith.extui %0 : i1 to i32
    %c0_i32_0 = arith.constant 0 : i32
    %2 = arith.cmpi ne, %1, %c0_i32_0 : i32
    scf.if %2 {
      %cst_10 = arith.constant 0.000000e+00 : f32
      %13 = vector.broadcast %cst_10 : f32 to vector<16x64xf32>
      %c0_11 = arith.constant 0 : index
      %c0_12 = arith.constant 0 : index
      %14 = vector.load %arg6[%c0_11, %c0_12] : memref<16x64xf32, #tpu.memory_space<vmem>>, vector<16x64xf32>
      tpu.vector_store %arg6[%c0_11, %c0_12], %13 {strides = array<i32>} : memref<16x64xf32, #tpu.memory_space<vmem>>, vector<16x64xf32>,
    } else {
    }
    %c0 = arith.constant 0 : index
    %c0_1 = arith.constant 0 : index
    %3 = vector.load %arg6[%c0, %c0_1] : memref<16x64xf32, #tpu.memory_space<vmem>>, vector<16x64xf32>
    %c0_2 = arith.constant 0 : index
    %c0_3 = arith.constant 0 : index
    %4 = vector.load %arg3[%c0_2, %c0_3] : memref<16x32xf32, #tpu.memory_space<vmem>>, vector<16x32xf32>
    %5 = arith.truncf %4 : vector<16x32xf32> to vector<16x32xbf16>
    %c0_4 = arith.constant 0 : index
    %c0_5 = arith.constant 0 : index
    %6 = vector.load %arg4[%c0_4, %c0_5] : memref<32x64xbf16, #tpu.memory_space<vmem>>, vector<32x64xbf16>
    %cst = arith.constant dense<0.000000e+00> : vector<16x64xf32>
    %7 = tpu.matmul %5, %6, %cst {dimension_numbers = #tpu.dot_dimension_numbers<[1], [0], [0], [1], [0, 0, 1, 1], [], []>} : vector<16x32xbf16>, vector<32x64xbf16>, vector<16x64xf32> -> vector<16x64xf32>
    %8 = arith.addf %3, %7 : vector<16x64xf32>
    %c0_6 = arith.constant 0 : index
    %c0_7 = arith.constant 0 : index
    %9 = vector.load %arg6[%c0_6, %c0_7] : memref<16x64xf32, #tpu.memory_space<vmem>>, vector<16x64xf32>
    tpu.vector_store %arg6[%c0_6, %c0_7], %8 {strides = array<i32>} : memref<16x64xf32, #tpu.memory_space<vmem>>, vector<16x64xf32>,
    %c0_i32_8 = arith.constant 0 : i32
    %10 = arith.cmpi eq, %arg2, %c0_i32_8 : i32
    %11 = arith.extui %10 : i1 to i32
    %c0_i32_9 = arith.constant 0 : i32
    %12 = arith.cmpi ne, %11, %c0_i32_9 : i32
    scf.if %12 {
      %c0_10 = arith.constant 0 : index
      %c0_11 = arith.constant 0 : index
      %13 = vector.load %arg6[%c0_10, %c0_11] : memref<16x64xf32, #tpu.memory_space<vmem>>, vector<16x64xf32>
      %c0_12 = arith.constant 0 : index
      %c0_13 = arith.constant 0 : index
      %14 = vector.load %arg5[%c0_12, %c0_13] : memref<16x64xf32, #tpu.memory_space<vmem>>, vector<16x64xf32>
      tpu.vector_store %arg5[%c0_12, %c0_13], %13 {strides = array<i32>} : memref<16x64xf32, #tpu.memory_space<vmem>>, vector<16x64xf32>,
    } else {
    }
    return
  }
  func.func @transform_0(%arg0: i32, %arg1: i32, %arg2: i32) -> (i32, i32) {
    %c0_i32 = arith.constant 0 : i32
    return %arg0, %arg2 : i32, i32
  }
  func.func @transform_1(%arg0: i32, %arg1: i32, %arg2: i32) -> (i32, i32) {
    %c0_i32 = arith.constant 0 : i32
    return %arg2, %arg1 : i32, i32
  }
  func.func @transform_2(%arg0: i32, %arg1: i32, %arg2: i32) -> (i32, i32) {
    %c0_i32 = arith.constant 0 : i32
    return %arg0, %arg1 : i32, i32
  }
}

module attributes {stable_mosaic.version = 11 : i64} {
  func.func @block_kernel(%arg0: i32, %arg1: memref<1x8x32xf32, #tpu.memory_space<vmem>>, %arg2: memref<1x32xf32, #tpu.memory_space<vmem>>, %arg3: memref<1x32xf32, #tpu.memory_space<vmem>>, %arg4: memref<1x32xf32, #tpu.memory_space<vmem>>, %arg5: memref<1x32xf32, #tpu.memory_space<vmem>>, %arg6: memref<32x96xbf16, #tpu.memory_space<vmem>>, %arg7: memref<32x32xbf16, #tpu.memory_space<vmem>>, %arg8: memref<1x32xf32, #tpu.memory_space<vmem>>, %arg9: memref<1x8x32xf32, #tpu.memory_space<vmem>>) attributes {dimension_semantics = [#tpu.dimension_semantics<parallel>], iteration_bounds = array<i64: 2>, scalar_prefetch = 0 : i64, scratch_operands = 0 : i64, tpu.core_type = #tpu.core_type<tc>, window_params = [{transform_indices = @transform_0, window_bounds = array<i64: 1, 8, 32>}, {pipeline_mode = #tpu.pipeline_mode<synchronous>, transform_indices = @transform_1, window_bounds = array<i64: 1, 32>}, {pipeline_mode = #tpu.pipeline_mode<synchronous>, transform_indices = @transform_2, window_bounds = array<i64: 1, 32>}, {pipeline_mode = #tpu.pipeline_mode<synchronous>, transform_indices = @transform_3, window_bounds = array<i64: 1, 32>}, {pipeline_mode = #tpu.pipeline_mode<synchronous>, transform_indices = @transform_4, window_bounds = array<i64: 1, 32>}, {pipeline_mode = #tpu.pipeline_mode<synchronous>, transform_indices = @transform_5, window_bounds = array<i64: 32, 96>}, {pipeline_mode = #tpu.pipeline_mode<synchronous>, transform_indices = @transform_6, window_bounds = array<i64: 32, 32>}, {pipeline_mode = #tpu.pipeline_mode<synchronous>, transform_indices = @transform_7, window_bounds = array<i64: 1, 32>}, {transform_indices = @transform_8, window_bounds = array<i64: 1, 8, 32>}]} {
    %c0 = arith.constant 0 : index
    %c0_0 = arith.constant 0 : index
    %c0_1 = arith.constant 0 : index
    %0 = vector.load %arg1[%c0, %c0_0, %c0_1] : memref<1x8x32xf32, #tpu.memory_space<vmem>>, vector<1x8x32xf32>
    %1 = vector.shape_cast %0 : vector<1x8x32xf32> to vector<8x32xf32>
    %c0_2 = arith.constant 0 : index
    %c0_3 = arith.constant 0 : index
    %2 = vector.load %arg2[%c0_2, %c0_3] : memref<1x32xf32, #tpu.memory_space<vmem>>, vector<1x32xf32>
    %c0_4 = arith.constant 0 : index
    %c0_5 = arith.constant 0 : index
    %3 = vector.load %arg3[%c0_4, %c0_5] : memref<1x32xf32, #tpu.memory_space<vmem>>, vector<1x32xf32>
    %c0_6 = arith.constant 0 : index
    %c0_7 = arith.constant 0 : index
    %4 = vector.load %arg4[%c0_6, %c0_7] : memref<1x32xf32, #tpu.memory_space<vmem>>, vector<1x32xf32>
    %c0_8 = arith.constant 0 : index
    %c0_9 = arith.constant 0 : index
    %5 = vector.load %arg5[%c0_8, %c0_9] : memref<1x32xf32, #tpu.memory_space<vmem>>, vector<1x32xf32>
    %c0_10 = arith.constant 0 : index
    %c0_11 = arith.constant 0 : index
    %6 = vector.load %arg6[%c0_10, %c0_11] : memref<32x96xbf16, #tpu.memory_space<vmem>>, vector<32x96xbf16>
    %c0_12 = arith.constant 0 : index
    %c0_13 = arith.constant 0 : index
    %7 = vector.load %arg7[%c0_12, %c0_13] : memref<32x32xbf16, #tpu.memory_space<vmem>>, vector<32x32xbf16>
    %c0_14 = arith.constant 0 : index
    %c0_15 = arith.constant 0 : index
    %8 = vector.load %arg8[%c0_14, %c0_15] : memref<1x32xf32, #tpu.memory_space<vmem>>, vector<1x32xf32>
    %9 = tpu.iota {dimensions = array<i32: 0>} : vector<8x8xi32>
    %10 = tpu.iota {dimensions = array<i32: 1>} : vector<8x8xi32>
    %11 = arith.cmpi sgt, %10, %9 : vector<8x8xi32>
    %cst = arith.constant dense<0.000000e+00> : vector<8xf32>
    %12 = vector.multi_reduction <add>, %1, %cst [1] : vector<8x32xf32> to vector<8xf32>
    %13 = vector.shape_cast %12 : vector<8xf32> to vector<8x1xf32>
    %cst_16 = arith.constant 3.200000e+01 : f32
    %14 = vector.broadcast %cst_16 : f32 to vector<8x1xf32>
    %15 = arith.divf %13, %14 : vector<8x1xf32>
    %16 = vector.broadcast %15 : vector<8x1xf32> to vector<8x32xf32>
    %17 = arith.subf %1, %16 : vector<8x32xf32>
    %18 = arith.mulf %17, %17 : vector<8x32xf32>
    %cst_17 = arith.constant dense<0.000000e+00> : vector<8xf32>
    %19 = vector.multi_reduction <add>, %18, %cst_17 [1] : vector<8x32xf32> to vector<8xf32>
    %20 = vector.shape_cast %19 : vector<8xf32> to vector<8x1xf32>
    %cst_18 = arith.constant 3.200000e+01 : f32
    %21 = vector.broadcast %cst_18 : f32 to vector<8x1xf32>
    %22 = arith.divf %20, %21 : vector<8x1xf32>
    %23 = vector.broadcast %15 : vector<8x1xf32> to vector<8x32xf32>
    %24 = arith.subf %1, %23 : vector<8x32xf32>
    %cst_19 = arith.constant 9.99999974E-6 : f32
    %25 = vector.broadcast %cst_19 : f32 to vector<8x1xf32>
    %26 = arith.addf %22, %25 : vector<8x1xf32>
    %27 = math.rsqrt %26 : vector<8x1xf32>
    %28 = vector.broadcast %27 : vector<8x1xf32> to vector<8x32xf32>
    %29 = arith.mulf %24, %28 : vector<8x32xf32>
    %30 = vector.broadcast %2 : vector<1x32xf32> to vector<8x32xf32>
    %31 = arith.mulf %30, %29 : vector<8x32xf32>
    %32 = vector.broadcast %3 : vector<1x32xf32> to vector<8x32xf32>
    %33 = arith.addf %31, %32 : vector<8x32xf32>
    %34 = arith.truncf %33 : vector<8x32xf32> to vector<8x32xbf16>
    %cst_20 = arith.constant dense<0.000000e+00> : vector<8x96xf32>
    %35 = tpu.matmul %34, %6, %cst_20 {dimension_numbers = #tpu.dot_dimension_numbers<[1], [0], [0], [1], [0, 0, 1, 1], [], []>} : vector<8x32xbf16>, vector<32x96xbf16>, vector<8x96xf32> -> vector<8x96xf32>
    %cst_21 = arith.constant 0.000000e+00 : f32
    %36 = vector.broadcast %cst_21 : f32 to vector<8x32xf32>
    %37 = vector.extract_strided_slice %35 {offsets = [0, 0], sizes = [8, 8], strides = [1, 1]} : vector<8x96xf32> to vector<8x8xf32>
    %38 = vector.extract_strided_slice %35 {offsets = [0, 32], sizes = [8, 8], strides = [1, 1]} : vector<8x96xf32> to vector<8x8xf32>
    %39 = vector.extract_strided_slice %35 {offsets = [0, 64], sizes = [8, 8], strides = [1, 1]} : vector<8x96xf32> to vector<8x8xf32>
    %cst_22 = arith.constant dense<0.000000e+00> : vector<8x8xf32>
    %40 = tpu.matmul %37, %38, %cst_22 {dimension_numbers = #tpu.dot_dimension_numbers<[1], [1], [0], [0], [0, 0, 1, 0], [], []>} : vector<8x8xf32>, vector<8x8xf32>, vector<8x8xf32> -> vector<8x8xf32>
    %cst_23 = arith.constant 0.353553385 : f32
    %41 = vector.broadcast %cst_23 : f32 to vector<8x8xf32>
    %42 = arith.mulf %40, %41 : vector<8x8xf32>
    %cst_24 = arith.constant -1.000000e+30 : f32
    %43 = vector.broadcast %cst_24 : f32 to vector<8x8xf32>
    %44 = arith.select %11, %43, %42 : vector<8x8xi1>, vector<8x8xf32>
    %cst_25 = arith.constant dense<0xFF800000> : vector<8xf32>
    %45 = vector.multi_reduction <maximumf>, %44, %cst_25 [1] : vector<8x8xf32> to vector<8xf32>
    %46 = vector.shape_cast %45 : vector<8xf32> to vector<8x1xf32>
    %47 = vector.broadcast %46 : vector<8x1xf32> to vector<8x8xf32>
    %48 = arith.subf %44, %47 : vector<8x8xf32>
    %49 = math.exp %48 : vector<8x8xf32>
    %cst_26 = arith.constant dense<0.000000e+00> : vector<8xf32>
    %50 = vector.multi_reduction <add>, %49, %cst_26 [1] : vector<8x8xf32> to vector<8xf32>
    %51 = vector.shape_cast %50 : vector<8xf32> to vector<8x1xf32>
    %52 = tpu.reciprocal %51 {approx = true} : vector<8x1xf32> -> vector<8x1xf32>
    %53 = vector.broadcast %52 : vector<8x1xf32> to vector<8x8xf32>
    %54 = arith.mulf %49, %53 : vector<8x8xf32>
    %55 = arith.truncf %54 : vector<8x8xf32> to vector<8x8xbf16>
    %56 = arith.truncf %39 : vector<8x8xf32> to vector<8x8xbf16>
    %cst_27 = arith.constant dense<0.000000e+00> : vector<8x8xf32>
    %57 = tpu.matmul %55, %56, %cst_27 {dimension_numbers = #tpu.dot_dimension_numbers<[1], [0], [0], [1], [0, 0, 1, 1], [], []>} : vector<8x8xbf16>, vector<8x8xbf16>, vector<8x8xf32> -> vector<8x8xf32>
    %58 = arith.truncf %57 : vector<8x8xf32> to vector<8x8xbf16>
    %59 = vector.extract_strided_slice %7 {offsets = [0, 0], sizes = [8, 32], strides = [1, 1]} : vector<32x32xbf16> to vector<8x32xbf16>
    %cst_28 = arith.constant dense<0.000000e+00> : vector<8x32xf32>
    %60 = tpu.matmul %58, %59, %cst_28 {dimension_numbers = #tpu.dot_dimension_numbers<[1], [0], [0], [1], [0, 0, 1, 1], [], []>} : vector<8x8xbf16>, vector<8x32xbf16>, vector<8x32xf32> -> vector<8x32xf32>
    %61 = arith.addf %36, %60 : vector<8x32xf32>
    %62 = vector.extract_strided_slice %35 {offsets = [0, 8], sizes = [8, 8], strides = [1, 1]} : vector<8x96xf32> to vector<8x8xf32>
    %63 = vector.extract_strided_slice %35 {offsets = [0, 40], sizes = [8, 8], strides = [1, 1]} : vector<8x96xf32> to vector<8x8xf32>
    %64 = vector.extract_strided_slice %35 {offsets = [0, 72], sizes = [8, 8], strides = [1, 1]} : vector<8x96xf32> to vector<8x8xf32>
    %cst_29 = arith.constant dense<0.000000e+00> : vector<8x8xf32>
    %65 = tpu.matmul %62, %63, %cst_29 {dimension_numbers = #tpu.dot_dimension_numbers<[1], [1], [0], [0], [0, 0, 1, 0], [], []>} : vector<8x8xf32>, vector<8x8xf32>, vector<8x8xf32> -> vector<8x8xf32>
    %cst_30 = arith.constant 0.353553385 : f32
    %66 = vector.broadcast %cst_30 : f32 to vector<8x8xf32>
    %67 = arith.mulf %65, %66 : vector<8x8xf32>
    %cst_31 = arith.constant -1.000000e+30 : f32
    %68 = vector.broadcast %cst_31 : f32 to vector<8x8xf32>
    %69 = arith.select %11, %68, %67 : vector<8x8xi1>, vector<8x8xf32>
    %cst_32 = arith.constant dense<0xFF800000> : vector<8xf32>
    %70 = vector.multi_reduction <maximumf>, %69, %cst_32 [1] : vector<8x8xf32> to vector<8xf32>
    %71 = vector.shape_cast %70 : vector<8xf32> to vector<8x1xf32>
    %72 = vector.broadcast %71 : vector<8x1xf32> to vector<8x8xf32>
    %73 = arith.subf %69, %72 : vector<8x8xf32>
    %74 = math.exp %73 : vector<8x8xf32>
    %cst_33 = arith.constant dense<0.000000e+00> : vector<8xf32>
    %75 = vector.multi_reduction <add>, %74, %cst_33 [1] : vector<8x8xf32> to vector<8xf32>
    %76 = vector.shape_cast %75 : vector<8xf32> to vector<8x1xf32>
    %77 = tpu.reciprocal %76 {approx = true} : vector<8x1xf32> -> vector<8x1xf32>
    %78 = vector.broadcast %77 : vector<8x1xf32> to vector<8x8xf32>
    %79 = arith.mulf %74, %78 : vector<8x8xf32>
    %80 = arith.truncf %79 : vector<8x8xf32> to vector<8x8xbf16>
    %81 = arith.truncf %64 : vector<8x8xf32> to vector<8x8xbf16>
    %cst_34 = arith.constant dense<0.000000e+00> : vector<8x8xf32>
    %82 = tpu.matmul %80, %81, %cst_34 {dimension_numbers = #tpu.dot_dimension_numbers<[1], [0], [0], [1], [0, 0, 1, 1], [], []>} : vector<8x8xbf16>, vector<8x8xbf16>, vector<8x8xf32> -> vector<8x8xf32>
    %83 = arith.truncf %82 : vector<8x8xf32> to vector<8x8xbf16>
    %84 = vector.extract_strided_slice %7 {offsets = [8, 0], sizes = [8, 32], strides = [1, 1]} : vector<32x32xbf16> to vector<8x32xbf16>
    %cst_35 = arith.constant dense<0.000000e+00> : vector<8x32xf32>
    %85 = tpu.matmul %83, %84, %cst_35 {dimension_numbers = #tpu.dot_dimension_numbers<[1], [0], [0], [1], [0, 0, 1, 1], [], []>} : vector<8x8xbf16>, vector<8x32xbf16>, vector<8x32xf32> -> vector<8x32xf32>
    %86 = arith.addf %61, %85 : vector<8x32xf32>
    %87 = vector.extract_strided_slice %35 {offsets = [0, 16], sizes = [8, 8], strides = [1, 1]} : vector<8x96xf32> to vector<8x8xf32>
    %88 = vector.extract_strided_slice %35 {offsets = [0, 48], sizes = [8, 8], strides = [1, 1]} : vector<8x96xf32> to vector<8x8xf32>
    %89 = vector.extract_strided_slice %35 {offsets = [0, 80], sizes = [8, 8], strides = [1, 1]} : vector<8x96xf32> to vector<8x8xf32>
    %cst_36 = arith.constant dense<0.000000e+00> : vector<8x8xf32>
    %90 = tpu.matmul %87, %88, %cst_36 {dimension_numbers = #tpu.dot_dimension_numbers<[1], [1], [0], [0], [0, 0, 1, 0], [], []>} : vector<8x8xf32>, vector<8x8xf32>, vector<8x8xf32> -> vector<8x8xf32>
    %cst_37 = arith.constant 0.353553385 : f32
    %91 = vector.broadcast %cst_37 : f32 to vector<8x8xf32>
    %92 = arith.mulf %90, %91 : vector<8x8xf32>
    %cst_38 = arith.constant -1.000000e+30 : f32
    %93 = vector.broadcast %cst_38 : f32 to vector<8x8xf32>
    %94 = arith.select %11, %93, %92 : vector<8x8xi1>, vector<8x8xf32>
    %cst_39 = arith.constant dense<0xFF800000> : vector<8xf32>
    %95 = vector.multi_reduction <maximumf>, %94, %cst_39 [1] : vector<8x8xf32> to vector<8xf32>
    %96 = vector.shape_cast %95 : vector<8xf32> to vector<8x1xf32>
    %97 = vector.broadcast %96 : vector<8x1xf32> to vector<8x8xf32>
    %98 = arith.subf %94, %97 : vector<8x8xf32>
    %99 = math.exp %98 : vector<8x8xf32>
    %cst_40 = arith.constant dense<0.000000e+00> : vector<8xf32>
    %100 = vector.multi_reduction <add>, %99, %cst_40 [1] : vector<8x8xf32> to vector<8xf32>
    %101 = vector.shape_cast %100 : vector<8xf32> to vector<8x1xf32>
    %102 = tpu.reciprocal %101 {approx = true} : vector<8x1xf32> -> vector<8x1xf32>
    %103 = vector.broadcast %102 : vector<8x1xf32> to vector<8x8xf32>
    %104 = arith.mulf %99, %103 : vector<8x8xf32>
    %105 = arith.truncf %104 : vector<8x8xf32> to vector<8x8xbf16>
    %106 = arith.truncf %89 : vector<8x8xf32> to vector<8x8xbf16>
    %cst_41 = arith.constant dense<0.000000e+00> : vector<8x8xf32>
    %107 = tpu.matmul %105, %106, %cst_41 {dimension_numbers = #tpu.dot_dimension_numbers<[1], [0], [0], [1], [0, 0, 1, 1], [], []>} : vector<8x8xbf16>, vector<8x8xbf16>, vector<8x8xf32> -> vector<8x8xf32>
    %108 = arith.truncf %107 : vector<8x8xf32> to vector<8x8xbf16>
    %109 = vector.extract_strided_slice %7 {offsets = [16, 0], sizes = [8, 32], strides = [1, 1]} : vector<32x32xbf16> to vector<8x32xbf16>
    %cst_42 = arith.constant dense<0.000000e+00> : vector<8x32xf32>
    %110 = tpu.matmul %108, %109, %cst_42 {dimension_numbers = #tpu.dot_dimension_numbers<[1], [0], [0], [1], [0, 0, 1, 1], [], []>} : vector<8x8xbf16>, vector<8x32xbf16>, vector<8x32xf32> -> vector<8x32xf32>
    %111 = arith.addf %86, %110 : vector<8x32xf32>
    %112 = vector.extract_strided_slice %35 {offsets = [0, 24], sizes = [8, 8], strides = [1, 1]} : vector<8x96xf32> to vector<8x8xf32>
    %113 = vector.extract_strided_slice %35 {offsets = [0, 56], sizes = [8, 8], strides = [1, 1]} : vector<8x96xf32> to vector<8x8xf32>
    %114 = vector.extract_strided_slice %35 {offsets = [0, 88], sizes = [8, 8], strides = [1, 1]} : vector<8x96xf32> to vector<8x8xf32>
    %cst_43 = arith.constant dense<0.000000e+00> : vector<8x8xf32>
    %115 = tpu.matmul %112, %113, %cst_43 {dimension_numbers = #tpu.dot_dimension_numbers<[1], [1], [0], [0], [0, 0, 1, 0], [], []>} : vector<8x8xf32>, vector<8x8xf32>, vector<8x8xf32> -> vector<8x8xf32>
    %cst_44 = arith.constant 0.353553385 : f32
    %116 = vector.broadcast %cst_44 : f32 to vector<8x8xf32>
    %117 = arith.mulf %115, %116 : vector<8x8xf32>
    %cst_45 = arith.constant -1.000000e+30 : f32
    %118 = vector.broadcast %cst_45 : f32 to vector<8x8xf32>
    %119 = arith.select %11, %118, %117 : vector<8x8xi1>, vector<8x8xf32>
    %cst_46 = arith.constant dense<0xFF800000> : vector<8xf32>
    %120 = vector.multi_reduction <maximumf>, %119, %cst_46 [1] : vector<8x8xf32> to vector<8xf32>
    %121 = vector.shape_cast %120 : vector<8xf32> to vector<8x1xf32>
    %122 = vector.broadcast %121 : vector<8x1xf32> to vector<8x8xf32>
    %123 = arith.subf %119, %122 : vector<8x8xf32>
    %124 = math.exp %123 : vector<8x8xf32>
    %cst_47 = arith.constant dense<0.000000e+00> : vector<8xf32>
    %125 = vector.multi_reduction <add>, %124, %cst_47 [1] : vector<8x8xf32> to vector<8xf32>
    %126 = vector.shape_cast %125 : vector<8xf32> to vector<8x1xf32>
    %127 = tpu.reciprocal %126 {approx = true} : vector<8x1xf32> -> vector<8x1xf32>
    %128 = vector.broadcast %127 : vector<8x1xf32> to vector<8x8xf32>
    %129 = arith.mulf %124, %128 : vector<8x8xf32>
    %130 = arith.truncf %129 : vector<8x8xf32> to vector<8x8xbf16>
    %131 = arith.truncf %114 : vector<8x8xf32> to vector<8x8xbf16>
    %cst_48 = arith.constant dense<0.000000e+00> : vector<8x8xf32>
    %132 = tpu.matmul %130, %131, %cst_48 {dimension_numbers = #tpu.dot_dimension_numbers<[1], [0], [0], [1], [0, 0, 1, 1], [], []>} : vector<8x8xbf16>, vector<8x8xbf16>, vector<8x8xf32> -> vector<8x8xf32>
    %133 = arith.truncf %132 : vector<8x8xf32> to vector<8x8xbf16>
    %134 = vector.extract_strided_slice %7 {offsets = [24, 0], sizes = [8, 32], strides = [1, 1]} : vector<32x32xbf16> to vector<8x32xbf16>
    %cst_49 = arith.constant dense<0.000000e+00> : vector<8x32xf32>
    %135 = tpu.matmul %133, %134, %cst_49 {dimension_numbers = #tpu.dot_dimension_numbers<[1], [0], [0], [1], [0, 0, 1, 1], [], []>} : vector<8x8xbf16>, vector<8x32xbf16>, vector<8x32xf32> -> vector<8x32xf32>
    %136 = arith.addf %111, %135 : vector<8x32xf32>
    %137 = vector.broadcast %8 : vector<1x32xf32> to vector<8x32xf32>
    %138 = arith.addf %136, %137 : vector<8x32xf32>
    %139 = arith.addf %1, %138 : vector<8x32xf32>
    %cst_50 = arith.constant dense<0.000000e+00> : vector<8xf32>
    %140 = vector.multi_reduction <add>, %139, %cst_50 [1] : vector<8x32xf32> to vector<8xf32>
    %141 = vector.shape_cast %140 : vector<8xf32> to vector<8x1xf32>
    %cst_51 = arith.constant 3.200000e+01 : f32
    %142 = vector.broadcast %cst_51 : f32 to vector<8x1xf32>
    %143 = arith.divf %141, %142 : vector<8x1xf32>
    %144 = vector.broadcast %143 : vector<8x1xf32> to vector<8x32xf32>
    %145 = arith.subf %139, %144 : vector<8x32xf32>
    %146 = arith.mulf %145, %145 : vector<8x32xf32>
    %cst_52 = arith.constant dense<0.000000e+00> : vector<8xf32>
    %147 = vector.multi_reduction <add>, %146, %cst_52 [1] : vector<8x32xf32> to vector<8xf32>
    %148 = vector.shape_cast %147 : vector<8xf32> to vector<8x1xf32>
    %cst_53 = arith.constant 3.200000e+01 : f32
    %149 = vector.broadcast %cst_53 : f32 to vector<8x1xf32>
    %150 = arith.divf %148, %149 : vector<8x1xf32>
    %151 = vector.broadcast %143 : vector<8x1xf32> to vector<8x32xf32>
    %152 = arith.subf %139, %151 : vector<8x32xf32>
    %cst_54 = arith.constant 9.99999974E-6 : f32
    %153 = vector.broadcast %cst_54 : f32 to vector<8x1xf32>
    %154 = arith.addf %150, %153 : vector<8x1xf32>
    %155 = math.rsqrt %154 : vector<8x1xf32>
    %156 = vector.broadcast %155 : vector<8x1xf32> to vector<8x32xf32>
    %157 = arith.mulf %152, %156 : vector<8x32xf32>
    %158 = vector.broadcast %4 : vector<1x32xf32> to vector<8x32xf32>
    %159 = arith.mulf %158, %157 : vector<8x32xf32>
    %160 = vector.broadcast %5 : vector<1x32xf32> to vector<8x32xf32>
    %161 = arith.addf %159, %160 : vector<8x32xf32>
    %162 = arith.truncf %161 : vector<8x32xf32> to vector<8x32xbf16>
    %cst_55 = arith.constant dense<0.000000e+00> : vector<8x96xf32>
    %163 = tpu.matmul %162, %6, %cst_55 {dimension_numbers = #tpu.dot_dimension_numbers<[1], [0], [0], [1], [0, 0, 1, 1], [], []>} : vector<8x32xbf16>, vector<32x96xbf16>, vector<8x96xf32> -> vector<8x96xf32>
    %cst_56 = arith.constant 0.000000e+00 : f32
    %164 = vector.broadcast %cst_56 : f32 to vector<8x32xf32>
    %165 = vector.extract_strided_slice %163 {offsets = [0, 0], sizes = [8, 8], strides = [1, 1]} : vector<8x96xf32> to vector<8x8xf32>
    %166 = vector.extract_strided_slice %163 {offsets = [0, 32], sizes = [8, 8], strides = [1, 1]} : vector<8x96xf32> to vector<8x8xf32>
    %167 = vector.extract_strided_slice %163 {offsets = [0, 64], sizes = [8, 8], strides = [1, 1]} : vector<8x96xf32> to vector<8x8xf32>
    %cst_57 = arith.constant dense<0.000000e+00> : vector<8x8xf32>
    %168 = tpu.matmul %165, %166, %cst_57 {dimension_numbers = #tpu.dot_dimension_numbers<[1], [1], [0], [0], [0, 0, 1, 0], [], []>} : vector<8x8xf32>, vector<8x8xf32>, vector<8x8xf32> -> vector<8x8xf32>
    %cst_58 = arith.constant 0.353553385 : f32
    %169 = vector.broadcast %cst_58 : f32 to vector<8x8xf32>
    %170 = arith.mulf %168, %169 : vector<8x8xf32>
    %cst_59 = arith.constant -1.000000e+30 : f32
    %171 = vector.broadcast %cst_59 : f32 to vector<8x8xf32>
    %172 = arith.select %11, %171, %170 : vector<8x8xi1>, vector<8x8xf32>
    %cst_60 = arith.constant dense<0xFF800000> : vector<8xf32>
    %173 = vector.multi_reduction <maximumf>, %172, %cst_60 [1] : vector<8x8xf32> to vector<8xf32>
    %174 = vector.shape_cast %173 : vector<8xf32> to vector<8x1xf32>
    %175 = vector.broadcast %174 : vector<8x1xf32> to vector<8x8xf32>
    %176 = arith.subf %172, %175 : vector<8x8xf32>
    %177 = math.exp %176 : vector<8x8xf32>
    %cst_61 = arith.constant dense<0.000000e+00> : vector<8xf32>
    %178 = vector.multi_reduction <add>, %177, %cst_61 [1] : vector<8x8xf32> to vector<8xf32>
    %179 = vector.shape_cast %178 : vector<8xf32> to vector<8x1xf32>
    %180 = tpu.reciprocal %179 {approx = true} : vector<8x1xf32> -> vector<8x1xf32>
    %181 = vector.broadcast %180 : vector<8x1xf32> to vector<8x8xf32>
    %182 = arith.mulf %177, %181 : vector<8x8xf32>
    %183 = arith.truncf %182 : vector<8x8xf32> to vector<8x8xbf16>
    %184 = arith.truncf %167 : vector<8x8xf32> to vector<8x8xbf16>
    %cst_62 = arith.constant dense<0.000000e+00> : vector<8x8xf32>
    %185 = tpu.matmul %183, %184, %cst_62 {dimension_numbers = #tpu.dot_dimension_numbers<[1], [0], [0], [1], [0, 0, 1, 1], [], []>} : vector<8x8xbf16>, vector<8x8xbf16>, vector<8x8xf32> -> vector<8x8xf32>
    %186 = arith.truncf %185 : vector<8x8xf32> to vector<8x8xbf16>
    %187 = vector.extract_strided_slice %7 {offsets = [0, 0], sizes = [8, 32], strides = [1, 1]} : vector<32x32xbf16> to vector<8x32xbf16>
    %cst_63 = arith.constant dense<0.000000e+00> : vector<8x32xf32>
    %188 = tpu.matmul %186, %187, %cst_63 {dimension_numbers = #tpu.dot_dimension_numbers<[1], [0], [0], [1], [0, 0, 1, 1], [], []>} : vector<8x8xbf16>, vector<8x32xbf16>, vector<8x32xf32> -> vector<8x32xf32>
    %189 = arith.addf %164, %188 : vector<8x32xf32>
    %190 = vector.extract_strided_slice %163 {offsets = [0, 8], sizes = [8, 8], strides = [1, 1]} : vector<8x96xf32> to vector<8x8xf32>
    %191 = vector.extract_strided_slice %163 {offsets = [0, 40], sizes = [8, 8], strides = [1, 1]} : vector<8x96xf32> to vector<8x8xf32>
    %192 = vector.extract_strided_slice %163 {offsets = [0, 72], sizes = [8, 8], strides = [1, 1]} : vector<8x96xf32> to vector<8x8xf32>
    %cst_64 = arith.constant dense<0.000000e+00> : vector<8x8xf32>
    %193 = tpu.matmul %190, %191, %cst_64 {dimension_numbers = #tpu.dot_dimension_numbers<[1], [1], [0], [0], [0, 0, 1, 0], [], []>} : vector<8x8xf32>, vector<8x8xf32>, vector<8x8xf32> -> vector<8x8xf32>
    %cst_65 = arith.constant 0.353553385 : f32
    %194 = vector.broadcast %cst_65 : f32 to vector<8x8xf32>
    %195 = arith.mulf %193, %194 : vector<8x8xf32>
    %cst_66 = arith.constant -1.000000e+30 : f32
    %196 = vector.broadcast %cst_66 : f32 to vector<8x8xf32>
    %197 = arith.select %11, %196, %195 : vector<8x8xi1>, vector<8x8xf32>
    %cst_67 = arith.constant dense<0xFF800000> : vector<8xf32>
    %198 = vector.multi_reduction <maximumf>, %197, %cst_67 [1] : vector<8x8xf32> to vector<8xf32>
    %199 = vector.shape_cast %198 : vector<8xf32> to vector<8x1xf32>
    %200 = vector.broadcast %199 : vector<8x1xf32> to vector<8x8xf32>
    %201 = arith.subf %197, %200 : vector<8x8xf32>
    %202 = math.exp %201 : vector<8x8xf32>
    %cst_68 = arith.constant dense<0.000000e+00> : vector<8xf32>
    %203 = vector.multi_reduction <add>, %202, %cst_68 [1] : vector<8x8xf32> to vector<8xf32>
    %204 = vector.shape_cast %203 : vector<8xf32> to vector<8x1xf32>
    %205 = tpu.reciprocal %204 {approx = true} : vector<8x1xf32> -> vector<8x1xf32>
    %206 = vector.broadcast %205 : vector<8x1xf32> to vector<8x8xf32>
    %207 = arith.mulf %202, %206 : vector<8x8xf32>
    %208 = arith.truncf %207 : vector<8x8xf32> to vector<8x8xbf16>
    %209 = arith.truncf %192 : vector<8x8xf32> to vector<8x8xbf16>
    %cst_69 = arith.constant dense<0.000000e+00> : vector<8x8xf32>
    %210 = tpu.matmul %208, %209, %cst_69 {dimension_numbers = #tpu.dot_dimension_numbers<[1], [0], [0], [1], [0, 0, 1, 1], [], []>} : vector<8x8xbf16>, vector<8x8xbf16>, vector<8x8xf32> -> vector<8x8xf32>
    %211 = arith.truncf %210 : vector<8x8xf32> to vector<8x8xbf16>
    %212 = vector.extract_strided_slice %7 {offsets = [8, 0], sizes = [8, 32], strides = [1, 1]} : vector<32x32xbf16> to vector<8x32xbf16>
    %cst_70 = arith.constant dense<0.000000e+00> : vector<8x32xf32>
    %213 = tpu.matmul %211, %212, %cst_70 {dimension_numbers = #tpu.dot_dimension_numbers<[1], [0], [0], [1], [0, 0, 1, 1], [], []>} : vector<8x8xbf16>, vector<8x32xbf16>, vector<8x32xf32> -> vector<8x32xf32>
    %214 = arith.addf %189, %213 : vector<8x32xf32>
    %215 = vector.extract_strided_slice %163 {offsets = [0, 16], sizes = [8, 8], strides = [1, 1]} : vector<8x96xf32> to vector<8x8xf32>
    %216 = vector.extract_strided_slice %163 {offsets = [0, 48], sizes = [8, 8], strides = [1, 1]} : vector<8x96xf32> to vector<8x8xf32>
    %217 = vector.extract_strided_slice %163 {offsets = [0, 80], sizes = [8, 8], strides = [1, 1]} : vector<8x96xf32> to vector<8x8xf32>
    %cst_71 = arith.constant dense<0.000000e+00> : vector<8x8xf32>
    %218 = tpu.matmul %215, %216, %cst_71 {dimension_numbers = #tpu.dot_dimension_numbers<[1], [1], [0], [0], [0, 0, 1, 0], [], []>} : vector<8x8xf32>, vector<8x8xf32>, vector<8x8xf32> -> vector<8x8xf32>
    %cst_72 = arith.constant 0.353553385 : f32
    %219 = vector.broadcast %cst_72 : f32 to vector<8x8xf32>
    %220 = arith.mulf %218, %219 : vector<8x8xf32>
    %cst_73 = arith.constant -1.000000e+30 : f32
    %221 = vector.broadcast %cst_73 : f32 to vector<8x8xf32>
    %222 = arith.select %11, %221, %220 : vector<8x8xi1>, vector<8x8xf32>
    %cst_74 = arith.constant dense<0xFF800000> : vector<8xf32>
    %223 = vector.multi_reduction <maximumf>, %222, %cst_74 [1] : vector<8x8xf32> to vector<8xf32>
    %224 = vector.shape_cast %223 : vector<8xf32> to vector<8x1xf32>
    %225 = vector.broadcast %224 : vector<8x1xf32> to vector<8x8xf32>
    %226 = arith.subf %222, %225 : vector<8x8xf32>
    %227 = math.exp %226 : vector<8x8xf32>
    %cst_75 = arith.constant dense<0.000000e+00> : vector<8xf32>
    %228 = vector.multi_reduction <add>, %227, %cst_75 [1] : vector<8x8xf32> to vector<8xf32>
    %229 = vector.shape_cast %228 : vector<8xf32> to vector<8x1xf32>
    %230 = tpu.reciprocal %229 {approx = true} : vector<8x1xf32> -> vector<8x1xf32>
    %231 = vector.broadcast %230 : vector<8x1xf32> to vector<8x8xf32>
    %232 = arith.mulf %227, %231 : vector<8x8xf32>
    %233 = arith.truncf %232 : vector<8x8xf32> to vector<8x8xbf16>
    %234 = arith.truncf %217 : vector<8x8xf32> to vector<8x8xbf16>
    %cst_76 = arith.constant dense<0.000000e+00> : vector<8x8xf32>
    %235 = tpu.matmul %233, %234, %cst_76 {dimension_numbers = #tpu.dot_dimension_numbers<[1], [0], [0], [1], [0, 0, 1, 1], [], []>} : vector<8x8xbf16>, vector<8x8xbf16>, vector<8x8xf32> -> vector<8x8xf32>
    %236 = arith.truncf %235 : vector<8x8xf32> to vector<8x8xbf16>
    %237 = vector.extract_strided_slice %7 {offsets = [16, 0], sizes = [8, 32], strides = [1, 1]} : vector<32x32xbf16> to vector<8x32xbf16>
    %cst_77 = arith.constant dense<0.000000e+00> : vector<8x32xf32>
    %238 = tpu.matmul %236, %237, %cst_77 {dimension_numbers = #tpu.dot_dimension_numbers<[1], [0], [0], [1], [0, 0, 1, 1], [], []>} : vector<8x8xbf16>, vector<8x32xbf16>, vector<8x32xf32> -> vector<8x32xf32>
    %239 = arith.addf %214, %238 : vector<8x32xf32>
    %240 = vector.extract_strided_slice %163 {offsets = [0, 24], sizes = [8, 8], strides = [1, 1]} : vector<8x96xf32> to vector<8x8xf32>
    %241 = vector.extract_strided_slice %163 {offsets = [0, 56], sizes = [8, 8], strides = [1, 1]} : vector<8x96xf32> to vector<8x8xf32>
    %242 = vector.extract_strided_slice %163 {offsets = [0, 88], sizes = [8, 8], strides = [1, 1]} : vector<8x96xf32> to vector<8x8xf32>
    %cst_78 = arith.constant dense<0.000000e+00> : vector<8x8xf32>
    %243 = tpu.matmul %240, %241, %cst_78 {dimension_numbers = #tpu.dot_dimension_numbers<[1], [1], [0], [0], [0, 0, 1, 0], [], []>} : vector<8x8xf32>, vector<8x8xf32>, vector<8x8xf32> -> vector<8x8xf32>
    %cst_79 = arith.constant 0.353553385 : f32
    %244 = vector.broadcast %cst_79 : f32 to vector<8x8xf32>
    %245 = arith.mulf %243, %244 : vector<8x8xf32>
    %cst_80 = arith.constant -1.000000e+30 : f32
    %246 = vector.broadcast %cst_80 : f32 to vector<8x8xf32>
    %247 = arith.select %11, %246, %245 : vector<8x8xi1>, vector<8x8xf32>
    %cst_81 = arith.constant dense<0xFF800000> : vector<8xf32>
    %248 = vector.multi_reduction <maximumf>, %247, %cst_81 [1] : vector<8x8xf32> to vector<8xf32>
    %249 = vector.shape_cast %248 : vector<8xf32> to vector<8x1xf32>
    %250 = vector.broadcast %249 : vector<8x1xf32> to vector<8x8xf32>
    %251 = arith.subf %247, %250 : vector<8x8xf32>
    %252 = math.exp %251 : vector<8x8xf32>
    %cst_82 = arith.constant dense<0.000000e+00> : vector<8xf32>
    %253 = vector.multi_reduction <add>, %252, %cst_82 [1] : vector<8x8xf32> to vector<8xf32>
    %254 = vector.shape_cast %253 : vector<8xf32> to vector<8x1xf32>
    %255 = tpu.reciprocal %254 {approx = true} : vector<8x1xf32> -> vector<8x1xf32>
    %256 = vector.broadcast %255 : vector<8x1xf32> to vector<8x8xf32>
    %257 = arith.mulf %252, %256 : vector<8x8xf32>
    %258 = arith.truncf %257 : vector<8x8xf32> to vector<8x8xbf16>
    %259 = arith.truncf %242 : vector<8x8xf32> to vector<8x8xbf16>
    %cst_83 = arith.constant dense<0.000000e+00> : vector<8x8xf32>
    %260 = tpu.matmul %258, %259, %cst_83 {dimension_numbers = #tpu.dot_dimension_numbers<[1], [0], [0], [1], [0, 0, 1, 1], [], []>} : vector<8x8xbf16>, vector<8x8xbf16>, vector<8x8xf32> -> vector<8x8xf32>
    %261 = arith.truncf %260 : vector<8x8xf32> to vector<8x8xbf16>
    %262 = vector.extract_strided_slice %7 {offsets = [24, 0], sizes = [8, 32], strides = [1, 1]} : vector<32x32xbf16> to vector<8x32xbf16>
    %cst_84 = arith.constant dense<0.000000e+00> : vector<8x32xf32>
    %263 = tpu.matmul %261, %262, %cst_84 {dimension_numbers = #tpu.dot_dimension_numbers<[1], [0], [0], [1], [0, 0, 1, 1], [], []>} : vector<8x8xbf16>, vector<8x32xbf16>, vector<8x32xf32> -> vector<8x32xf32>
    %264 = arith.addf %239, %263 : vector<8x32xf32>
    %265 = vector.broadcast %8 : vector<1x32xf32> to vector<8x32xf32>
    %266 = arith.addf %264, %265 : vector<8x32xf32>
    %267 = arith.addf %139, %266 : vector<8x32xf32>
    %c0_85 = arith.constant 0 : index
    %c0_86 = arith.constant 0 : index
    %c0_87 = arith.constant 0 : index
    %268 = vector.load %arg9[%c0_85, %c0_86, %c0_87] : memref<1x8x32xf32, #tpu.memory_space<vmem>>, vector<1x8x32xf32>
    %269 = vector.shape_cast %268 : vector<1x8x32xf32> to vector<8x32xf32>
    %270 = vector.shape_cast %267 : vector<8x32xf32> to vector<1x8x32xf32>
    tpu.vector_store %arg9[%c0_85, %c0_86, %c0_87], %270 {strides = array<i32>} : memref<1x8x32xf32, #tpu.memory_space<vmem>>, vector<1x8x32xf32>,
    return
  }
  func.func @transform_0(%arg0: i32) -> (i32, i32, i32) {
    %c0_i32 = arith.constant 0 : i32
    %c0_i32_0 = arith.constant 0 : i32
    %c0_i32_1 = arith.constant 0 : i32
    return %arg0, %c0_i32, %c0_i32_0 : i32, i32, i32
  }
  func.func @transform_1(%arg0: i32) -> (i32, i32) {
    %c0_i32 = arith.constant 0 : i32
    %c0_i32_0 = arith.constant 0 : i32
    %c0_i32_1 = arith.constant 0 : i32
    return %c0_i32, %c0_i32_0 : i32, i32
  }
  func.func @transform_2(%arg0: i32) -> (i32, i32) {
    %c0_i32 = arith.constant 0 : i32
    %c0_i32_0 = arith.constant 0 : i32
    %c0_i32_1 = arith.constant 0 : i32
    return %c0_i32, %c0_i32_0 : i32, i32
  }
  func.func @transform_3(%arg0: i32) -> (i32, i32) {
    %c0_i32 = arith.constant 0 : i32
    %c0_i32_0 = arith.constant 0 : i32
    %c0_i32_1 = arith.constant 0 : i32
    return %c0_i32, %c0_i32_0 : i32, i32
  }
  func.func @transform_4(%arg0: i32) -> (i32, i32) {
    %c0_i32 = arith.constant 0 : i32
    %c0_i32_0 = arith.constant 0 : i32
    %c0_i32_1 = arith.constant 0 : i32
    return %c0_i32, %c0_i32_0 : i32, i32
  }
  func.func @transform_5(%arg0: i32) -> (i32, i32) {
    %c0_i32 = arith.constant 0 : i32
    %c0_i32_0 = arith.constant 0 : i32
    %c0_i32_1 = arith.constant 0 : i32
    return %c0_i32, %c0_i32_0 : i32, i32
  }
  func.func @transform_6(%arg0: i32) -> (i32, i32) {
    %c0_i32 = arith.constant 0 : i32
    %c0_i32_0 = arith.constant 0 : i32
    %c0_i32_1 = arith.constant 0 : i32
    return %c0_i32, %c0_i32_0 : i32, i32
  }
  func.func @transform_7(%arg0: i32) -> (i32, i32) {
    %c0_i32 = arith.constant 0 : i32
    %c0_i32_0 = arith.constant 0 : i32
    %c0_i32_1 = arith.constant 0 : i32
    return %c0_i32, %c0_i32_0 : i32, i32
  }
  func.func @transform_8(%arg0: i32) -> (i32, i32, i32) {
    %c0_i32 = arith.constant 0 : i32
    %c0_i32_0 = arith.constant 0 : i32
    %c0_i32_1 = arith.constant 0 : i32
    return %arg0, %c0_i32, %c0_i32_0 : i32, i32, i32
  }
}

</mosaic_0001>

<bundles_post_ra>
// kernel: _lambda_.7
= control target key start
LH: loop header
LB: loop body
LE: loop exit
PB: predicated region body
PF: predicated region fallthrough
CT: control target
= control target key end

     0   :  { %v159_v1 = vmov 0.0   ;;  %vm160_vm0 = vmmov 0   ;;  %vm17_vm1 = vcmask 523264   ;;  %s209_s0 = inlined_call_operand.vmem [shape: f32[16,32], index: 0, kind: input, shape index: {}]   ;;  %s210_s1 = inlined_call_operand.vmem [shape: bf16[32,64], index: 1, kind: input, shape index: {}]   ;;  %s211_s2 = inlined_call_operand.hbm [shape: f32[16,64], index: 2, kind: output, shape index: {}]  }
   0x1   :  { %v133_v0 = vld [vmem:[%s210_s1] sm:$0xff]   ;;  %120 = vmatprep.subr.bf16.mxu0 %v159_v1  ;;  %v134_v2 = vld [vmem:[%s210_s1 + $0x8] sm:$0xff]   ;;  %124 = vmatprep.mubr.msk.bf16.mxu0 %vm160_vm0, %v159_v1 }
   0x2   :  { %121 = vmatpush3.bf16.msra.mxu0 %v133_v0  ;;  %v22_v3 = vld [vmem:[%s209_s0] sm:$0xff]  ;;  %v23_v4 = vld [vmem:[%s209_s0 + $0x8] sm:$0xff] }
   0x3   :  { %7 = vsyncpa [#allocation4], 0  ;;  %122 = vmatprep.subr.bf16.mxu0 %v159_v1  ;;  %18 = vst.msk [vmem:[#allocation2] sm:$0xff] %vm17_vm1, %v159_v1  ;;  %v24_v5 = vpack.c.bf16 %v23_v4, %v22_v3  ;;  %vm41_vm2 = vcmask 261120   ;;  %s161_s0 = smov [#allocation3]  }
   0x4   :  { %19 = vst.msk [vmem:[#allocation2 + $0x8] sm:$0xff] %vm17_vm1, %v159_v1  ;;  %s103_s1 = sshll.u32 %s161_s0, 4  ;;  %s104_s1 = int_to_ptr.vmem [resolvable:$true] %s103_s1 }
   0x5   :  { %s135_s17 = scalar_lea.vmem %s104_s1, 256  ;;  %p140_p1 = scmp.lt.s32.totalorder %s104_s1, %s104_s1 }
   0x6   :  { %123 = vmatpush3.bf16.msra.mxu0 %v134_v2  ;;  %p136_p0 = scmp.ne.s32.totalorder %s104_s1, %s135_s17  ;;  %p141_p2 = scmp.lt.s32.totalorder %s135_s17, %s135_s17 }
   0x8   :  { %p142_p3 = por %p141_p2, %p140_p1 }
   0x9   :  { %125 = vmatmul.mubr.msk.bf16.vlgmr.msra.gmra.mrb[0].mxu0 %vm41_vm2, %v24_v5 }
   0xa   :  { %v20_v6 = vld [vmem:[#allocation2] sm:$0xff]  ;;  %p143_p4 = pnand %p142_p3, %p136_p0 }
   0xb   :  { %v21_v8 = vld [vmem:[#allocation2 + $0x8] sm:$0xff] }
  0xdc   :  { %v79_v7 = vpop.f32.mrb[0].mxu0 }
  0xdd   :  { %v86_v9 = vadd.f32 %v79_v7, %v20_v6  ;;  %v126_v10 = vpop.f32.mrb[1].mxu0 }
  0xde   :  { %v82_v11 = vpop.f32.mrb[2].mxu0 }
  0xdf   :  { %89 = vst.msk [vmem:[#allocation2] sm:$0xff] %vm17_vm1, %v86_v9  ;;  %v87_v12 = vadd.f32 %v82_v11, %v21_v8  ;;  %v127_v13 = vpop.f32.mrb[3].mxu0 }
  0xe1   :  { %90 = vst.msk [vmem:[#allocation2 + $0x8] sm:$0xff] %vm17_vm1, %v87_v12 }
  0xe6   :  { %v94_v14 = vld [vmem:[#allocation2] sm:$0xff] }
  0xe7   :  { %96 = vst.msk [vmem:[#allocation3] sm:$0xff] %vm17_vm1, %v94_v14 }
  0xe8   :  { %v95_v15 = vld [vmem:[#allocation2 + $0x8] sm:$0xff] }
  0xe9   :  { %97 = vst.msk [vmem:[#allocation3 + $0x8] sm:$0xff] %vm17_vm1, %v95_v15 }
  0xea   :  { %146 = shalt.err (!%p143_p4)
}
  0xeb   :  { %s147_s20 = scalar_lea.hbm %s211_s2, 256 }
  0xec   :  { %p148_p5 = scmp.ne.s32.totalorder %s211_s2, %s147_s20  ;;  %p151_p6 = scmp.lt.u32.totalorder %s147_s20, %s211_s2 }
  0xee   :  { %p153_p7 = pnand %p151_p6, %p148_p5 }
  0xf0   :  { %156 = shalt.err (!%p153_p7)
}
  0xf1   :  { %s162_s25 = smov 128   ;;  %s163_s26 = smov 8  }
  0xf2   :  { %109 = dma.vmem_to_hbm [thread:$0]  %s104_s1, 256, %s211_s2, [#allocation4], %s162_s25, %s162_s25, %s163_s26  }
  0xf3   :  { %157 = dma.done.wait [#allocation4], 256  }
  0xf4   :  { %158 = vsyncadd [#allocation4], 4294967040 }
  0xf5   :  { %113 = vsyncpa [#allocation4], 1 }

// kernel: _lambda_.6
= control target key start
LH: loop header
LB: loop body
LE: loop exit
PB: predicated region body
PF: predicated region fallthrough
CT: control target
= control target key end

     0   :  { %vm16_vm0 = vcmask 261120   ;;  %s118_s0 = inlined_call_operand.vmem [shape: f32[16,32], index: 0, kind: input, shape index: {}]   ;;  %s119_s1 = inlined_call_operand.vmem [shape: f32[1,32], index: 1, kind: input, shape index: {}]   ;;  %s120_s2 = inlined_call_operand.vmem [shape: f32[1,32], index: 2, kind: input, shape index: {}]   ;;  %s121_s3 = inlined_call_operand.vmem [shape: f32[16,32], index: 3, kind: output, shape index: {}]  }
   0x1   :  { %v14_v0 = vld [vmem:[%s118_s0] sm:$0xff]  ;;  %v15_v1 = vld [vmem:[%s118_s0 + $0x8] sm:$0xff] }
   0x2   :  { %v17_v2 = vsel %vm16_vm0, %v14_v0, 0.0  ;;  %v20_v3 = vsel %vm16_vm0, %v15_v1, 0.0  ;;  %v68_v21 = vld [vmem:[%s119_s1] ss:$0 sm:$0xff] }
   0x3   :  { %18 = vadd.xlane.f32.xlu0 %v17_v2  ;;  %v69_v23 = vld [vmem:[%s120_s2] ss:$0 sm:$0xff] }
   0x7   :  { %21 = vadd.xlane.f32.xlu0 %v20_v3 }
  0x90   :  { %v19_v4 = vpop.xlane.xlu0 %18 }
  0x91   :  { %v24_v5 = vmul.f32 0.03125, %v19_v4 }
  0x93   :  { %v26_v6 = vsub.f32 %v14_v0, %v24_v5 }
  0x94   :  { %v22_v7 = vpop.xlane.xlu0 %21 }
  0x95   :  { %v25_v8 = vmul.f32 0.03125, %v22_v7  ;;  %v28_v9 = vmul.f32 %v26_v6, %v26_v6 }
  0x97   :  { %v27_v10 = vsub.f32 %v15_v1, %v25_v8  ;;  %v30_v11 = vsel %vm16_vm0, %v28_v9, 0.0 }
  0x98   :  { %31 = vadd.xlane.f32.xlu1 %v30_v11 }
  0x99   :  { %v29_v12 = vmul.f32 %v27_v10, %v27_v10 }
  0x9b   :  { %v33_v13 = vsel %vm16_vm0, %v29_v12, 0.0 }
  0x9c   :  { %34 = vadd.xlane.f32.xlu1 %v33_v13 }
 0x125   :  { %v32_v14 = vpop.xlane.xlu1 %31 }
 0x126   :  { %v36_v15 = vmul.f32 0.03125, %v32_v14 }
 0x128   :  { %v39_v16 = vadd.f32 1e-05, %v36_v15 }
 0x129   :  { %v35_v17 = vpop.xlane.xlu1 %34 }
 0x12a   :  { %70 = vrsqrt.f32 %v39_v16  ;;  %v37_v18 = vmul.f32 0.03125, %v35_v17 }
 0x12c   :  { %v40_v19 = vadd.f32 1e-05, %v37_v18 }
 0x12e   :  { %72 = vrsqrt.f32 %v40_v19 }
 0x134   :  { %v71_v20 = vpop.eup %70 }
 0x135   :  { %v43_v22 = vmul.f32 %v71_v20, %v26_v6 }
 0x137   :  { %v51_v24 = vmul.f32 %v68_v21, %v43_v22 }
 0x138   :  { %v73_v25 = vpop.eup %72 }
 0x139   :  { %v60_v26 = vadd.f32 %v69_v23, %v51_v24  ;;  %v44_v27 = vmul.f32 %v73_v25, %v27_v10 }
 0x13b   :  { %62 = vst.msk [vmem:[%s121_s3] sm:$0xff] %vm16_vm0, %v60_v26  ;;  %v52_v28 = vmul.f32 %v68_v21, %v44_v27 }
 0x13d   :  { %v61_v29 = vadd.f32 %v69_v23, %v52_v28 }
 0x13f   :  { %63 = vst.msk [vmem:[%s121_s3 + $0x8] sm:$0xff] %vm16_vm0, %v61_v29 }

// kernel: _lambda_.4
= control target key start
LH: loop header
LB: loop body
LE: loop exit
PB: predicated region body
PF: predicated region fallthrough
CT: control target
= control target key end

     0   :  { %s2414_s27 = smov 0   ;;  %s2740_s0 = inlined_call_operand.vmem [shape: f32[2,8,32], index: 0, kind: input, shape index: {}]   ;;  %s2741_s1 = inlined_call_operand.vmem [shape: f32[1,32], index: 1, kind: input, shape index: {}]   ;;  %s2742_s2 = inlined_call_operand.vmem [shape: f32[1,32], index: 2, kind: input, shape index: {}]   ;;  %s2743_s3 = inlined_call_operand.vmem [shape: f32[1,32], index: 3, kind: input, shape index: {}]   ;;  %s2744_s4 = inlined_call_operand.vmem [shape: f32[1,32], index: 4, kind: input, shape index: {}]   ;;  %s2745_s5 = inlined_call_operand.vmem [shape: bf16[32,96], index: 5, kind: input, shape index: {}]   ;;  %s2746_s6 = inlined_call_operand.vmem [shape: bf16[32,32], index: 6, kind: input, shape index: {}]   ;;  %s2747_s7 = inlined_call_operand.vmem [shape: f32[1,32], index: 7, kind: input, shape index: {}]   ;;  %s2748_s8 = inlined_call_operand.vmem [shape: f32[2,8,32], index: 8, kind: output, shape index: {}]  }
   0x1 LB: > { %s2033_s28 = sadd.s32 4294967295, %s2354_s27   ;;  %p2037_p0 = scmp.ge.s32.totalorder %s2354_s27, 1  ;;  %s2354_s27 = sphi %s2414_s27, %s18_s27  }
   0x2   : > { %p261_p1 = scmp.lt.s32.totalorder %s2354_s27, 3 }
   0x4   : > { %p262_p2 = pnand %p2037_p0, %p261_p1 }
   0x5   : > { %p293_p3 = scmp.lt.s32.totalorder (!%p262_p2), %s2033_s28, 1  ;;  %vm321_vm0 = vcmask (!%p262_p2), 261120   ;;  %v2439_v7 = vld [vmem:[%s2745_s5] sm:$0xff] (!%p262_p2)   ;;  %v2356_v8 = vmov (!%p262_p2), 0.0   ;;  %vm2357_vm1 = vmmov (!%p262_p2), 0   ;;  %v2448_v9 = vld [vmem:[%s2745_s5 + $0x8] sm:$0xff] (!%p262_p2)   ;;  %v316_v27 = vlaneseq (!%p262_p2) }
   0x6   : > { %265 = sbr.rel (%p262_p2) target bundleno = 5826 (0x16c2), region = 52  ;;  %2137 = vmatprep.subr.bf16.mxu0 (!%p262_p2), %v2356_v8  ;;  %2141 = vmatprep.mubr.msk.bf16.mxu0 (!%p262_p2), %vm2357_vm1, %v2356_v8  ;;  %v2040_v14 = vld [vmem:[%s2741_s1] ss:$0 sm:$0xff] (!%p262_p2)  ;;  %s2358_s19 = smov (!%p262_p2), 120   ;;  %vm409_vm2 = vcmask (!%p262_p2), 64512   ;;  %vm505_vm4 = vcmask (!%p262_p2), 1043456  }
   0x7   : > { %2138 = vmatpush3.bf16.msra.mxu0 (!%p262_p2), %v2439_v7  ;;  %2145 = vmatprep.subr.mxu1 (!%p262_p2), %v2356_v8  ;;  %v2041_v16 = vld [vmem:[%s2742_s2] ss:$0 sm:$0xff] (!%p262_p2)  ;;  %s2359_s20 = smov (!%p262_p2), 96   ;;  %s2360_s21 = smov (!%p262_p2), 88   ;;  %v317_v28 = vshrl.u32 (!%p262_p2), %v316_v27, 7  ;;  %v319_v29 = vand.u32 (!%p262_p2), 127, %v316_v27 }
   0x8   : > { %2139 = vmatprep.subr.bf16.mxu0 (!%p262_p2), %v2356_v8  ;;  %2147 = vmatprep.mubr.msk.f32.mxu1 (!%p262_p2), %vm2357_vm1, %v2356_v8  ;;  %s2361_s22 = smov (!%p262_p2), 56   ;;  %s2362_s23 = smov (!%p262_p2), 64  }
   0x9   : > { %vm2484_vm3 = vcmp.gt.s32.totalorder (!%p262_p2), %v319_v29, %v317_v28  ;;  %s2363_s24 = smov (!%p262_p2), 80   ;;  %s2364_s25 = smov (!%p262_p2), 112  }
   0xa   : > { %s2365_s11 = smov (!%p262_p2), 48   ;;  %s2366_s12 = smov (!%p262_p2), 104  }
   0xb   : > { %2140 = vmatpush3.bf16.msra.mxu0 (!%p262_p2), %v2448_v9  ;;  %s2367_s13 = smov (!%p262_p2), 72   ;;  %s2368_s16 = smov (!%p262_p2), 40  }
   0xc   : > { %2156 = vmatprep.subr.mxu0 (!%p262_p2), %v2356_v8 }
   0xd   : > { %s2752_s28 = smov (!%p293_p3, %s2033_s28), 1 }
   0xe   : > { %s2038_s29 = sshll.u32 %s2752_s28, 3 }
   0xf   : > { %s296_s10 = scalar_lea.vmem %s2740_s0, %s2038_s29 }
  0x10   : > { %v2430_v0 = vld [vmem:[%s296_s10] sm:$0xff] }
  0x11   : > { %v322_v1 = vsel %vm321_vm0, %v2430_v0, 0.0 }
  0x12   : > { %323 = vadd.xlane.f32.xlu0 %v322_v1  ;;  %v311_v1 = vld [vmem:[%s2746_s6] sm:$0xf] }
  0x9f   : > { %v324_v2 = vpop.xlane.xlu0 %323 }
  0xa0   : > { %v326_v3 = vmul.f32 0.03125, %v324_v2  ;;  %v2522_v2 = vsel %vm505_vm4, %v311_v1, 0 }
  0xa2   : > { %v327_v4 = vsub.f32 %v2430_v0, %v326_v3  ;;  %v312_v3 = vld [vmem:[%s2746_s6 + $0x4] sm:$0xf] }
  0xa4   : > { %v328_v5 = vmul.f32 %v327_v4, %v327_v4 }
  0xa6   : > { %v329_v6 = vsel %vm321_vm0, %v328_v5, 0.0 }
  0xa7   : > { %330 = vadd.xlane.f32.xlu0 %v329_v6 }
 0x134   : > { %v331_v10 = vpop.xlane.xlu0 %330 }
 0x135   : > { %v332_v11 = vmul.f32 0.03125, %v331_v10 }
 0x137   : > { %v333_v12 = vadd.f32 1e-05, %v332_v11 }
 0x139   : > { %2312 = vrsqrt.f32 %v333_v12 }
 0x143   : > { %v2313_v13 = vpop.eup %2312 }
 0x144   : > { %v335_v15 = vmul.f32 %v2313_v13, %v327_v4  ;;  %v2529_v4 = vsel %vm505_vm4, %v312_v3, 0 }
 0x146   : > { %v342_v17 = vmul.f32 %v2040_v14, %v335_v15 }
 0x148   : > { %v349_v18 = vadd.f32 %v2041_v16, %v342_v17 }
 0x14a   : > { %v350_v19 = vpack.c.bf16 %v349_v18, %v349_v18 }
 0x14c   : > { %2142 = vmatmul.mubr.msk.bf16.vlgmr.msra.gmra.mrb[0].mxu0 %vm321_vm0, %v350_v19 }
 0x14d   : > { %2158 = vmatprep.mubr.msk.f32.mxu0 %vm2357_vm1, %v2356_v8 }
 0x21f   : > { %v2465_v20 = vpop.f32.mrb[0].mxu0 }
 0x220   : > { %550 = vrot.lane.b32.xlu0 %v2465_v20, %s2358_s19  ;;  %407 = vrot.lane.b32.xlu1 %v2465_v20, %s2359_s20  ;;  %v2143_v21 = vpop.f32.mrb[1].mxu0  ;;  %v2496_v41 = vpack.c.bf16 %v2465_v20, %v2465_v20 }
 0x221   : > { %v403_v22 = vpop.f32.mrb[2].mxu0 }
 0x222   : > { %v2144_v23 = vpop.f32.mrb[3].mxu0 }
 0x224   : > { %552 = vrot.lane.b32.xlu1 %v2465_v20, %s2360_s21 }
 0x292   : > { %v408_v24 = vpop.permute.xlu1 %407  ;;  %v551_v26 = vpop.permute.xlu0 %550 }
 0x293   : > { %2146 = vmatpush3.xpose.msk.msra.mxu1 %vm409_vm2, %v408_v24 }
 0x294   : > { %2150 = vmatprep.subr.bf16.mxu1 %v2356_v8 }
 0x296   : > { %2148 = vmatmul.mubr.msk.f32.vlgmr.msra.gmra.mrb[0].mxu1 %vm409_vm2, %v2465_v20  ;;  %v553_v25 = vpop.permute.xlu1 %552 }
 0x297   : > { %2157 = vmatpush3.xpose.msk.msra.mxu0 %vm409_vm2, %v553_v25  ;;  %2152 = vmatprep.mubr.msk.bf16.mxu1 %vm2357_vm1, %v2356_v8 }
 0x298   : > { %2167 = vmatprep.subr.bf16.mxu0 %v2356_v8 }
 0x29a   : > { %2159 = vmatmul.mubr.msk.f32.vlgmr.msra.gmra.mrb[4].mxu0 %vm409_vm2, %v551_v26 }
 0x29b   : > { %2169 = vmatprep.mubr.msk.bf16.mxu0 %vm2357_vm1, %v2356_v8  ;;  %2168 = vmatpush3.bf16.msra.mxu0 %v2529_v4 }
 0x29c   : > { %2179 = vmatprep.subr.mxu0 %v2356_v8 }
 0x369   : > { %v480_v30 = vpop.f32.mrb[0].mxu1 }
 0x36a   : > { %v484_v32 = vmul.f32 0.35355338, %v480_v30  ;;  %v2149_v33 = vpop.f32.mrb[1].mxu1 }
 0x36c   : > { %v485_v34 = vsel %vm2484_vm3, -1e+30, %v484_v32 }
 0x36d   : > { %v624_v35 = vpop.f32.mrb[4].mxu0  ;;  %v486_v36 = vsel %vm409_vm2, %v485_v34, -inf }
 0x36e   : > { %v628_v37 = vmul.f32 0.35355338, %v624_v35  ;;  %487 = vmax.xlane.f32.xlu1 %v486_v36  ;;  %v2160_v38 = vpop.f32.mrb[5].mxu0 }
 0x370   : > { %v629_v39 = vsel %vm2484_vm3, -1e+30, %v628_v37 }
 0x371   : > { %v630_v40 = vsel %vm409_vm2, %v629_v39, -inf }
 0x372   : > { %631 = vmax.xlane.f32.xlu0 %v630_v40 }
 0x388   : > { %642 = vrot.lane.b32.xlu0 %v2496_v41, %s2361_s22 }
 0x3fb   : > { %v488_v42 = vpop.xlane.xlu1 %487 }
 0x3fc   : > { %v489_v43 = vsub.f32 %v485_v34, %v488_v42 }
 0x3fe   : > { %v490_v44 = vmul.f32 1.442695, %v489_v43 }
 0x3ff   : > { %v632_v45 = vpop.xlane.xlu0 %631 }
 0x400   : > { %2314 = vpow2.f32 %v490_v44  ;;  %v633_v46 = vsub.f32 %v629_v39, %v632_v45 }
 0x402   : > { %v634_v47 = vmul.f32 1.442695, %v633_v46 }
 0x403   : > { %v643_v58 = vpop.permute.xlu0 %642 }
 0x404   : > { %2316 = vpow2.f32 %v634_v47  ;;  %v648_v61 = vsel %vm505_vm4, %v643_v58, 0 }
 0x40a   : > { %v2315_v48 = vpop.eup %2314 }
 0x40b   : > { %v492_v49 = vsel %vm409_vm2, %v2315_v48, 0.0 }
 0x40c   : > { %493 = vadd.xlane.f32.xlu1 %v492_v49 }
 0x40e   : > { %v2317_v50 = vpop.eup %2316 }
 0x40f   : > { %v636_v51 = vsel %vm409_vm2, %v2317_v50, 0.0 }
 0x410   : > { %637 = vadd.xlane.f32.xlu1 %v636_v51 }
 0x421   : > { %500 = vrot.lane.b32.xlu1 %v2496_v41, %s2362_s23 }
 0x425   : > { %785 = vrot.lane.b32.xlu1 %v2465_v20, %s2363_s24 }
 0x429   : > { %783 = vrot.lane.b32.xlu1 %v2465_v20, %s2364_s25 }
 0x499   : > { %v494_v52 = vpop.xlane.xlu1 %493 }
 0x49a   : > { %2318 = vrcp.f32 %v494_v52 }
 0x49d   : > { %v638_v53 = vpop.xlane.xlu1 %637 }
 0x49e   : > { %2320 = vrcp.f32 %v638_v53 }
 0x4a1   : > { %v501_v54 = vpop.permute.xlu1 %500 }
 0x4a2   : > { %v507_v55 = vsel %vm505_vm4, %v501_v54, 0 }
 0x4a3   : > { %2151 = vmatpush3.bf16.msra.mxu1 %v507_v55 }
 0x4a4   : > { %v2319_v56 = vpop.eup %2318  ;;  %2161 = vmatprep.subr.bf16.mxu1 %v2356_v8 }
 0x4a5   : > { %v496_v57 = vmul.f32 %v2319_v56, %v2315_v48  ;;  %v786_v17 = vpop.permute.xlu1 %785 }
 0x4a7   : > { %v497_v59 = vpack.c.bf16 %v496_v57, %v496_v57 }
 0x4a8   : > { %v2321_v60 = vpop.eup %2320 }
 0x4a9   : > { %2153 = vmatmul.mubr.msk.bf16.vlgmr.msra.gmra.mrb[4].mxu1 %vm409_vm2, %v497_v59  ;;  %v640_v62 = vmul.f32 %v2321_v60, %v2317_v50  ;;  %v784_v19 = vpop.permute.xlu1 %783 }
 0x4aa   : > { %2162 = vmatpush3.bf16.msra.mxu1 %v648_v61  ;;  %2163 = vmatprep.mubr.msk.bf16.mxu1 %vm2357_vm1, %v2356_v8 }
 0x4ab   : > { %2173 = vmatprep.subr.bf16.mxu1 %v2356_v8  ;;  %v641_v63 = vpack.c.bf16 %v640_v62, %v640_v62 }
 0x4b1   : > { %2164 = vmatmul.mubr.msk.bf16.vlgmr.msra.gmra.mrb[8].mxu1 %vm409_vm2, %v641_v63 }
 0x4b2   : > { %2175 = vmatprep.mubr.msk.bf16.mxu1 %vm2357_vm1, %v2356_v8  ;;  %2174 = vmatpush3.bf16.msra.mxu1 %v2522_v2 }
 0x4b3   : > { %2190 = vmatprep.subr.bf16.mxu1 %v2356_v8 }
 0x57c   : > { %v543_v5 = vpop.f32.mrb[4].mxu1 }
 0x57d   : > { %v549_v6 = vpack.c.bf16 %v543_v5, %v543_v5  ;;  %v2154_v10 = vpop.f32.mrb[5].mxu1 }
 0x57e   : > { %v546_v11 = vpop.f32.mrb[6].mxu1 }
 0x57f   : > { %v2155_v12 = vpop.f32.mrb[7].mxu1  ;;  %2176 = vmatmul.mubr.msk.bf16.vlgmr.msra.gmra.mrb[12].mxu1 %vm409_vm2, %v549_v6 }
 0x580   : > { %2192 = vmatprep.mubr.msk.bf16.mxu1 %vm2357_vm1, %v2356_v8 }
 0x584   : > { %v684_v13 = vpop.f32.mrb[8].mxu1 }
 0x585   : > { %v690_v14 = vpack.c.bf16 %v684_v13, %v684_v13  ;;  %v2165_v15 = vpop.f32.mrb[9].mxu1 }
 0x586   : > { %v687_v16 = vpop.f32.mrb[10].mxu1 }
 0x587   : > { %v2166_v18 = vpop.f32.mrb[11].mxu1  ;;  %2170 = vmatmul.mubr.msk.bf16.vlgmr.msra.gmra.mrb[8].mxu0 %vm409_vm2, %v690_v14 }
 0x588   : > { %2180 = vmatpush3.xpose.msk.msra.mxu0 %vm409_vm2, %v786_v17  ;;  %2181 = vmatprep.mubr.msk.f32.mxu0 %vm2357_vm1, %v2356_v8 }
 0x589   : > { %2184 = vmatprep.subr.bf16.mxu0 %v2356_v8 }
 0x58f   : > { %2182 = vmatmul.mubr.msk.f32.vlgmr.msra.gmra.mrb[6].mxu0 %vm409_vm2, %v784_v19 }
 0x590   : > { %2186 = vmatprep.mubr.msk.bf16.mxu0 %vm2357_vm1, %v2356_v8 }
 0x652   : > { %v777_v21 = vpop.f32.mrb[12].mxu1 }
 0x653   : > { %v2177_v22 = vpop.f32.mrb[13].mxu1 }
 0x654   : > { %v780_v23 = vpop.f32.mrb[14].mxu1 }
 0x655   : > { %v2178_v24 = vpop.f32.mrb[15].mxu1 }
 0x65a   : > { %v731_v25 = vpop.f32.mrb[8].mxu0 }
 0x65b   : > { %v2545_v26 = vadd.f32 %v777_v21, %v731_v25  ;;  %v2171_v27 = vpop.f32.mrb[9].mxu0 }
 0x65c   : > { %v734_v28 = vpop.f32.mrb[10].mxu0 }
 0x65d   : > { %v2172_v29 = vpop.f32.mrb[11].mxu0 }
 0x662   : > { %v857_v30 = vpop.f32.mrb[6].mxu0 }
 0x663   : > { %v861_v32 = vmul.f32 0.35355338, %v857_v30  ;;  %v2183_v33 = vpop.f32.mrb[7].mxu0 }
 0x665   : > { %v862_v34 = vsel %vm2484_vm3, -1e+30, %v861_v32 }
 0x666   : > { %v863_v35 = vsel %vm409_vm2, %v862_v34, -inf }
 0x667   : > { %864 = vmax.xlane.f32.xlu1 %v863_v35 }
 0x678   : > { %875 = vrot.lane.b32.xlu1 %v2496_v41, %s2365_s11 }
 0x67c   : > { %971 = vrot.lane.b32.xlu1 %v2465_v20, %s2366_s12 }
 0x6f4   : > { %v865_v36 = vpop.xlane.xlu1 %864 }
 0x6f5   : > { %v866_v37 = vsub.f32 %v862_v34, %v865_v36 }
 0x6f7   : > { %v867_v38 = vmul.f32 1.442695, %v866_v37 }
 0x6f8   : > { %v876_v39 = vpop.permute.xlu1 %875 }
 0x6f9   : > { %2322 = vpow2.f32 %v867_v38  ;;  %v881_v40 = vsel %vm505_vm4, %v876_v39, 0 }
 0x6fa   : > { %2185 = vmatpush3.bf16.msra.mxu0 %v881_v40 }
 0x6fb   : > { %2196 = vmatprep.subr.mxu0 %v2356_v8 }
 0x6fc   : > { %v972_v49 = vpop.permute.xlu1 %971 }
 0x703   : > { %v2323_v42 = vpop.eup %2322 }
 0x704   : > { %v869_v43 = vsel %vm409_vm2, %v2323_v42, 0.0 }
 0x705   : > { %870 = vadd.xlane.f32.xlu0 %v869_v43 }
 0x71b   : > { %973 = vrot.lane.b32.xlu0 %v2465_v20, %s2367_s13  ;;  %v313_v20 = vld [vmem:[%s2746_s6 + $0x8] sm:$0xf] }
 0x71c   : > { %v2571_v50 = vsel %vm505_vm4, %v313_v20, 0 }
 0x71d   : > { %2191 = vmatpush3.bf16.msra.mxu1 %v2571_v50 }
 0x71e   : > { %2201 = vmatprep.subr.bf16.mxu1 %v2356_v8 }
 0x792   : > { %v871_v44 = vpop.xlane.xlu0 %870 }
 0x793   : > { %2324 = vrcp.f32 %v871_v44 }
 0x796   : > { %v974_v48 = vpop.permute.xlu0 %973 }
 0x79d   : > { %v2325_v45 = vpop.eup %2324 }
 0x79e   : > { %v873_v46 = vmul.f32 %v2325_v45, %v2323_v42  ;;  %v2063_v45 = vld [vmem:[%s2744_s4] ss:$0 sm:$0xff] }
 0x7a0   : > { %v874_v47 = vpack.c.bf16 %v873_v46, %v873_v46 }
 0x7a2   : > { %2187 = vmatmul.mubr.msk.bf16.vlgmr.msra.gmra.mrb[12].mxu0 %vm409_vm2, %v874_v47 }
 0x7a3   : > { %2197 = vmatpush3.xpose.msk.msra.mxu0 %vm409_vm2, %v974_v48  ;;  %2198 = vmatprep.mubr.msk.f32.mxu0 %vm2357_vm1, %v2356_v8 }
 0x7a4   : > { %2207 = vmatprep.subr.bf16.mxu0 %v2356_v8 }
 0x7aa   : > { %2199 = vmatmul.mubr.msk.f32.vlgmr.msra.gmra.mrb[16].mxu0 %vm409_vm2, %v972_v49 }
 0x7ab   : > { %2209 = vmatprep.mubr.msk.bf16.mxu0 %vm2357_vm1, %v2356_v8 }
 0x875   : > { %v917_v51 = vpop.f32.mrb[12].mxu0 }
 0x876   : > { %v923_v52 = vpack.c.bf16 %v917_v51, %v917_v51  ;;  %v2188_v53 = vpop.f32.mrb[13].mxu0 }
 0x877   : > { %v920_v54 = vpop.f32.mrb[14].mxu0 }
 0x878   : > { %v2189_v55 = vpop.f32.mrb[15].mxu0  ;;  %2193 = vmatmul.mubr.msk.bf16.vlgmr.msra.gmra.mrb[16].mxu1 %vm409_vm2, %v923_v52 }
 0x879   : > { %2203 = vmatprep.mubr.msk.bf16.mxu1 %vm2357_vm1, %v2356_v8 }
 0x87d   : > { %v1045_v56 = vpop.f32.mrb[16].mxu0 }
 0x87e   : > { %v1049_v57 = vmul.f32 0.35355338, %v1045_v56  ;;  %v2200_v58 = vpop.f32.mrb[17].mxu0 }
 0x880   : > { %v1050_v59 = vsel %vm2484_vm3, -1e+30, %v1049_v57 }
 0x881   : > { %v1051_v60 = vsel %vm409_vm2, %v1050_v59, -inf }
 0x882   : > { %1052 = vmax.xlane.f32.xlu1 %v1051_v60 }
 0x90f   : > { %v1053_v61 = vpop.xlane.xlu1 %1052 }
 0x910   : > { %v1054_v62 = vsub.f32 %v1050_v59, %v1053_v61 }
 0x912   : > { %v1055_v63 = vmul.f32 1.442695, %v1054_v62 }
 0x914   : > { %2326 = vpow2.f32 %v1055_v63 }
 0x91e   : > { %v2327_v1 = vpop.eup %2326 }
 0x91f   : > { %v1057_v3 = vsel %vm409_vm2, %v2327_v1, 0.0 }
 0x920   : > { %1058 = vadd.xlane.f32.xlu0 %v1057_v3 }
 0x936   : > { %1063 = vrot.lane.b32.xlu0 %v2496_v41, %s2368_s16  ;;  %v314_v41 = vld [vmem:[%s2746_s6 + $0xc] sm:$0xf] }
 0x937   : > { %v2598_v19 = vsel %vm505_vm4, %v314_v41, 0 }
 0x938   : > { %2208 = vmatpush3.bf16.msra.mxu0 %v2598_v19 }
 0x939   : > { %2221 = vmatprep.subr.mxu0 %v2356_v8 }
 0x94b   : > { %v964_v5 = vpop.f32.mrb[16].mxu1 }
 0x94c   : > { %v970_v6 = vadd.f32 %v964_v5, %v2545_v26  ;;  %v2194_v10 = vpop.f32.mrb[17].mxu1 }
 0x94d   : > { %v967_v11 = vpop.f32.mrb[18].mxu1 }
 0x94e   : > { %v2195_v12 = vpop.f32.mrb[19].mxu1 }
 0x9ad   : > { %v1059_v13 = vpop.xlane.xlu0 %1058 }
 0x9ae   : > { %2328 = vrcp.f32 %v1059_v13 }
 0x9b1   : > { %v1064_v14 = vpop.permute.xlu0 %1063 }
 0x9b2   : > { %v1069_v15 = vsel %vm505_vm4, %v1064_v14, 0 }
 0x9b3   : > { %2202 = vmatpush3.bf16.msra.mxu1 %v1069_v15 }
 0x9b4   : > { %2213 = vmatprep.subr.bf16.mxu1 %v2356_v8 }
 0x9b8   : > { %v2329_v16 = vpop.eup %2328 }
 0x9b9   : > { %v1061_v17 = vmul.f32 %v2329_v16, %v2327_v1 }
 0x9bb   : > { %v1062_v18 = vpack.c.bf16 %v1061_v17, %v1061_v17 }
 0x9bd   : > { %2204 = vmatmul.mubr.msk.bf16.vlgmr.msra.gmra.mrb[20].mxu1 %vm409_vm2, %v1062_v18 }
 0x9be   : > { %2214 = vmatpush3.bf16.msra.mxu1 %v2439_v7  ;;  %2217 = vmatprep.mubr.msk.bf16.mxu1 %vm2357_vm1, %v2356_v8 }
 0x9bf   : > { %2215 = vmatprep.subr.bf16.mxu1 %v2356_v8 }
 0x9c2   : > { %2216 = vmatpush3.bf16.msra.mxu1 %v2448_v9  ;;  %v2608_v9 = vld [vmem:[%s2747_s7] ss:$0 sm:$0xff] }
 0x9c3   : > { %2232 = vmatprep.subr.mxu1 %v2356_v8 }
 0xa90   : > { %v1105_v7 = vpop.f32.mrb[20].mxu1 }
 0xa91   : > { %v1111_v21 = vpack.c.bf16 %v1105_v7, %v1105_v7  ;;  %v2205_v22 = vpop.f32.mrb[21].mxu1 }
 0xa92   : > { %v1108_v23 = vpop.f32.mrb[22].mxu1 }
 0xa93   : > { %v2206_v24 = vpop.f32.mrb[23].mxu1  ;;  %2210 = vmatmul.mubr.msk.bf16.vlgmr.msra.gmra.mrb[20].mxu0 %vm409_vm2, %v1111_v21 }
 0xa94   : > { %2223 = vmatprep.mubr.msk.f32.mxu0 %vm2357_vm1, %v2356_v8 }
 0xb66   : > { %v1152_v25 = vpop.f32.mrb[20].mxu0 }
 0xb67   : > { %v1158_v26 = vadd.f32 %v1152_v25, %v970_v6  ;;  %v2211_v27 = vpop.f32.mrb[21].mxu0 }
 0xb68   : > { %v1155_v28 = vpop.f32.mrb[22].mxu0 }
 0xb69   : > { %v1165_v29 = vadd.f32 %v2608_v9, %v1158_v26  ;;  %v2212_v30 = vpop.f32.mrb[23].mxu0 }
 0xb6b   : > { %v2612_v32 = vadd.f32 %v1165_v29, %v2430_v0  ;;  %v2062_v0 = vld [vmem:[%s2743_s3] ss:$0 sm:$0xff] }
 0xb6d   : > { %v1167_v33 = vsel %vm321_vm0, %v2612_v32, 0.0 }
 0xb6e   : > { %1168 = vadd.xlane.f32.xlu1 %v1167_v33 }
 0xbfb   : > { %v1169_v34 = vpop.xlane.xlu1 %1168 }
 0xbfc   : > { %v1170_v35 = vmul.f32 0.03125, %v1169_v34 }
 0xbfe   : > { %v1171_v36 = vsub.f32 %v2612_v32, %v1170_v35 }
 0xc00   : > { %v1172_v37 = vmul.f32 %v1171_v36, %v1171_v36 }
 0xc02   : > { %v1173_v38 = vsel %vm321_vm0, %v1172_v37, 0.0 }
 0xc03   : > { %1174 = vadd.xlane.f32.xlu1 %v1173_v38 }
 0xc90   : > { %v1175_v39 = vpop.xlane.xlu1 %1174 }
 0xc91   : > { %v1176_v40 = vmul.f32 0.03125, %v1175_v39 }
 0xc93   : > { %v1177_v42 = vadd.f32 1e-05, %v1176_v40 }
 0xc95   : > { %2330 = vrsqrt.f32 %v1177_v42 }
 0xc9f   : > { %v2331_v43 = vpop.eup %2330 }
 0xca0   : > { %v1179_v44 = vmul.f32 %v2331_v43, %v1171_v36 }
 0xca2   : > { %v1186_v46 = vmul.f32 %v2062_v0, %v1179_v44 }
 0xca4   : > { %v1193_v47 = vadd.f32 %v2063_v45, %v1186_v46 }
 0xca6   : > { %v1194_v48 = vpack.c.bf16 %v1193_v47, %v1193_v47 }
 0xca8   : > { %2218 = vmatmul.mubr.msk.bf16.vlgmr.msra.gmra.mrb[24].mxu1 %vm321_vm0, %v1194_v48 }
 0xca9   : > { %2234 = vmatprep.mubr.msk.f32.mxu1 %vm2357_vm1, %v2356_v8 }
 0xd7b   : > { %v2627_v49 = vpop.f32.mrb[24].mxu1 }
 0xd7c   : > { %1380 = vrot.lane.b32.xlu0 %v2627_v49, %s2358_s19  ;;  %1382 = vrot.lane.b32.xlu1 %v2627_v49, %s2360_s21  ;;  %v2219_v20 = vpop.f32.mrb[25].mxu1  ;;  %v2656_v18 = vpack.c.bf16 %v2627_v49, %v2627_v49  ;;  %s300_s21 = scalar_lea.vmem %s2748_s8, %s2038_s29 }
 0xd7d   : > { %v1235_v51 = vpop.f32.mrb[26].mxu1 }
 0xd7e   : > { %v2220_v52 = vpop.f32.mrb[27].mxu1 }
 0xd80   : > { %1239 = vrot.lane.b32.xlu0 %v2627_v49, %s2359_s20 }
 0xdee   : > { %v1381_v53 = vpop.permute.xlu0 %1380  ;;  %v1383_v54 = vpop.permute.xlu1 %1382 }
 0xdef   : > { %2233 = vmatpush3.xpose.msk.msra.mxu1 %vm409_vm2, %v1383_v54 }
 0xdf0   : > { %2237 = vmatprep.subr.bf16.mxu1 %v2356_v8 }
 0xdf2   : > { %v1240_v55 = vpop.permute.xlu0 %1239  ;;  %2235 = vmatmul.mubr.msk.f32.vlgmr.msra.gmra.mrb[2].mxu1 %vm409_vm2, %v1381_v53 }
 0xdf3   : > { %2222 = vmatpush3.xpose.msk.msra.mxu0 %vm409_vm2, %v1240_v55  ;;  %2239 = vmatprep.mubr.msk.bf16.mxu1 %vm2357_vm1, %v2356_v8 }
 0xdf4   : > { %2226 = vmatprep.subr.bf16.mxu0 %v2356_v8 }
 0xdf6   : > { %2224 = vmatmul.mubr.msk.f32.vlgmr.msra.gmra.mrb[18].mxu0 %vm409_vm2, %v2627_v49 }
 0xdf7   : > { %2228 = vmatprep.mubr.msk.bf16.mxu0 %vm2357_vm1, %v2356_v8 }
 0xec5   : > { %v1454_v56 = vpop.f32.mrb[2].mxu1 }
 0xec6   : > { %v1458_v57 = vmul.f32 0.35355338, %v1454_v56  ;;  %v2236_v58 = vpop.f32.mrb[3].mxu1 }
 0xec8   : > { %v1459_v59 = vsel %vm2484_vm3, -1e+30, %v1458_v57 }
 0xec9   : > { %v1311_v60 = vpop.f32.mrb[18].mxu0  ;;  %v1460_v61 = vsel %vm409_vm2, %v1459_v59, -inf }
 0xeca   : > { %v1315_v62 = vmul.f32 0.35355338, %v1311_v60  ;;  %1461 = vmax.xlane.f32.xlu1 %v1460_v61  ;;  %v2225_v63 = vpop.f32.mrb[19].mxu0 }
 0xecc   : > { %v1316_v1 = vsel %vm2484_vm3, -1e+30, %v1315_v62 }
 0xecd   : > { %v1317_v3 = vsel %vm409_vm2, %v1316_v1, -inf }
 0xece   : > { %1318 = vmax.xlane.f32.xlu1 %v1317_v3 }
 0xf57   : > { %v1462_v5 = vpop.xlane.xlu1 %1461 }
 0xf58   : > { %v1463_v6 = vsub.f32 %v1459_v59, %v1462_v5 }
 0xf5a   : > { %v1464_v10 = vmul.f32 1.442695, %v1463_v6 }
 0xf5b   : > { %v1319_v11 = vpop.xlane.xlu1 %1318 }
 0xf5c   : > { %2332 = vpow2.f32 %v1464_v10  ;;  %v1320_v12 = vsub.f32 %v1316_v1, %v1319_v11 }
 0xf5e   : > { %v1321_v13 = vmul.f32 1.442695, %v1320_v12 }
 0xf60   : > { %2334 = vpow2.f32 %v1321_v13 }
 0xf66   : > { %v2333_v14 = vpop.eup %2332 }
 0xf67   : > { %v1466_v15 = vsel %vm409_vm2, %v2333_v14, 0.0 }
 0xf68   : > { %1467 = vadd.xlane.f32.xlu0 %v1466_v15 }
 0xf6a   : > { %v2335_v16 = vpop.eup %2334 }
 0xf6b   : > { %v1323_v17 = vsel %vm409_vm2, %v2335_v16, 0.0 }
 0xf6c   : > { %1324 = vadd.xlane.f32.xlu1 %v1323_v17 }
 0xf7d   : > { %1331 = vrot.lane.b32.xlu1 %v2656_v18, %s2362_s23 }
 0xf7e   : > { %1472 = vrot.lane.b32.xlu0 %v2656_v18, %s2361_s22 }
 0xf82   : > { %1609 = vrot.lane.b32.xlu0 %v2627_v49, %s2363_s24 }
 0xf86   : > { %1607 = vrot.lane.b32.xlu0 %v2627_v49, %s2364_s25 }
 0xff5   : > { %v1468_v41 = vpop.xlane.xlu0 %1467 }
 0xff6   : > { %2336 = vrcp.f32 %v1468_v41 }
 0xff9   : > { %v1473_v7 = vpop.permute.xlu0 %1472  ;;  %v1325_v21 = vpop.xlane.xlu1 %1324 }
 0xffa   : > { %v1478_v22 = vsel %vm505_vm4, %v1473_v7, 0  ;;  %2338 = vrcp.f32 %v1325_v21 }
 0xffb   : > { %2238 = vmatpush3.bf16.msra.mxu1 %v1478_v22 }
 0xffc   : > { %2249 = vmatprep.subr.bf16.mxu1 %v2356_v8 }
 0xffd   : > { %v1332_v23 = vpop.permute.xlu1 %1331 }
 0xffe   : > { %v1337_v24 = vsel %vm505_vm4, %v1332_v23, 0 }
 0xfff   : > { %2227 = vmatpush3.bf16.msra.mxu0 %v1337_v24 }
0x1000   : > { %v2337_v25 = vpop.eup %2336  ;;  %2243 = vmatprep.subr.bf16.mxu0 %v2356_v8 }
0x1001   : > { %v1470_v26 = vmul.f32 %v2337_v25, %v2333_v14 }
0x1003   : > { %v1471_v27 = vpack.c.bf16 %v1470_v26, %v1470_v26 }
0x1004   : > { %v2339_v28 = vpop.eup %2338 }
0x1005   : > { %v1327_v29 = vmul.f32 %v2339_v28, %v2335_v16  ;;  %2240 = vmatmul.mubr.msk.bf16.vlgmr.msra.gmra.mrb[28].mxu1 %vm409_vm2, %v1471_v27 }
0x1006   : > { %2250 = vmatpush3.bf16.msra.mxu1 %v2522_v2  ;;  %2251 = vmatprep.mubr.msk.bf16.mxu1 %vm2357_vm1, %v2356_v8  ;;  %v1610_v2 = vpop.permute.xlu0 %1609 }
0x1007   : > { %v1328_v30 = vpack.c.bf16 %v1327_v29, %v1327_v29  ;;  %2266 = vmatprep.subr.bf16.mxu1 %v2356_v8 }
0x1009   : > { %2229 = vmatmul.mubr.msk.bf16.vlgmr.msra.gmra.mrb[24].mxu0 %vm409_vm2, %v1328_v30 }
0x100a   : > { %2244 = vmatpush3.bf16.msra.mxu0 %v2529_v4  ;;  %2245 = vmatprep.mubr.msk.bf16.mxu0 %vm2357_vm1, %v2356_v8  ;;  %v1608_v43 = vpop.permute.xlu0 %1607 }
0x100b   : > { %2255 = vmatprep.subr.mxu0 %v2356_v8 }
0x10d8   : > { %v1514_v33 = vpop.f32.mrb[28].mxu1 }
0x10d9   : > { %v1520_v34 = vpack.c.bf16 %v1514_v33, %v1514_v33  ;;  %v2241_v35 = vpop.f32.mrb[29].mxu1 }
0x10da   : > { %v1517_v36 = vpop.f32.mrb[30].mxu1 }
0x10db   : > { %v2242_v37 = vpop.f32.mrb[31].mxu1  ;;  %2246 = vmatmul.mubr.msk.bf16.vlgmr.msra.gmra.mrb[28].mxu0 %vm409_vm2, %v1520_v34 }
0x10dc   : > { %2256 = vmatpush3.xpose.msk.msra.mxu0 %vm409_vm2, %v1610_v2  ;;  %v1373_v38 = vpop.f32.mrb[24].mxu0  ;;  %2257 = vmatprep.mubr.msk.f32.mxu0 %vm2357_vm1, %v2356_v8 }
0x10dd   : > { %v1379_v4 = vpack.c.bf16 %v1373_v38, %v1373_v38  ;;  %v2230_v39 = vpop.f32.mrb[25].mxu0  ;;  %2260 = vmatprep.subr.bf16.mxu0 %v2356_v8 }
0x10de   : > { %v1376_v40 = vpop.f32.mrb[26].mxu0 }
0x10df   : > { %v2231_v42 = vpop.f32.mrb[27].mxu0  ;;  %2252 = vmatmul.mubr.msk.bf16.vlgmr.msra.gmra.mrb[32].mxu1 %vm409_vm2, %v1379_v4 }
0x10e0   : > { %2267 = vmatpush3.bf16.msra.mxu1 %v2571_v50  ;;  %2268 = vmatprep.mubr.msk.bf16.mxu1 %vm2357_vm1, %v2356_v8 }
0x10e1   : > { %2277 = vmatprep.subr.bf16.mxu1 %v2356_v8 }
0x10e3   : > { %2258 = vmatmul.mubr.msk.f32.vlgmr.msra.gmra.mrb[32].mxu0 %vm409_vm2, %v1608_v43 }
0x10e4   : > { %2262 = vmatprep.mubr.msk.bf16.mxu0 %vm2357_vm1, %v2356_v8 }
0x11ae   : > { %v1558_v0 = vpop.f32.mrb[28].mxu0 }
0x11af   : > { %v2247_v44 = vpop.f32.mrb[29].mxu0 }
0x11b0   : > { %v1561_v45 = vpop.f32.mrb[30].mxu0 }
0x11b1   : > { %v2248_v46 = vpop.f32.mrb[31].mxu0 }
0x11b2   : > { %v1601_v47 = vpop.f32.mrb[32].mxu1 }
0x11b3   : > { %v2693_v48 = vadd.f32 %v1601_v47, %v1558_v0  ;;  %v2253_v20 = vpop.f32.mrb[33].mxu1 }
0x11b4   : > { %v1604_v50 = vpop.f32.mrb[34].mxu1 }
0x11b5   : > { %v2254_v51 = vpop.f32.mrb[35].mxu1 }
0x11b6   : > { %v1681_v52 = vpop.f32.mrb[32].mxu0 }
0x11b7   : > { %v1685_v53 = vmul.f32 0.35355338, %v1681_v52  ;;  %v2259_v54 = vpop.f32.mrb[33].mxu0 }
0x11b9   : > { %v1686_v55 = vsel %vm2484_vm3, -1e+30, %v1685_v53 }
0x11ba   : > { %v1687_v56 = vsel %vm409_vm2, %v1686_v55, -inf }
0x11bb   : > { %1688 = vmax.xlane.f32.xlu1 %v1687_v56 }
0x11cc   : > { %1794 = vrot.lane.b32.xlu1 %v2627_v49, %s2367_s13 }
0x11d0   : > { %1792 = vrot.lane.b32.xlu1 %v2627_v49, %s2366_s12 }
0x1248   : > { %v1689_v57 = vpop.xlane.xlu1 %1688 }
0x1249   : > { %v1690_v58 = vsub.f32 %v1686_v55, %v1689_v57 }
0x124b   : > { %v1691_v59 = vmul.f32 1.442695, %v1690_v58 }
0x124c   : > { %v1795_v6 = vpop.permute.xlu1 %1794 }
0x124d   : > { %2340 = vpow2.f32 %v1691_v59 }
0x1250   : > { %v1793_v10 = vpop.permute.xlu1 %1792 }
0x1257   : > { %v2341_v60 = vpop.eup %2340 }
0x1258   : > { %v1693_v61 = vsel %vm409_vm2, %v2341_v60, 0.0 }
0x1259   : > { %1694 = vadd.xlane.f32.xlu0 %v1693_v61 }
0x126f   : > { %1699 = vrot.lane.b32.xlu0 %v2656_v18, %s2365_s11 }
0x12e6   : > { %v1695_v62 = vpop.xlane.xlu0 %1694 }
0x12e7   : > { %2342 = vrcp.f32 %v1695_v62 }
0x12ea   : > { %v1700_v63 = vpop.permute.xlu0 %1699 }
0x12eb   : > { %v1705_v1 = vsel %vm505_vm4, %v1700_v63, 0 }
0x12ec   : > { %2261 = vmatpush3.bf16.msra.mxu0 %v1705_v1 }
0x12ed   : > { %2272 = vmatprep.subr.mxu0 %v2356_v8 }
0x12f1   : > { %v2343_v49 = vpop.eup %2342 }
0x12f2   : > { %v1697_v3 = vmul.f32 %v2343_v49, %v2341_v60 }
0x12f4   : > { %v1698_v5 = vpack.c.bf16 %v1697_v3, %v1697_v3 }
0x12f6   : > { %2263 = vmatmul.mubr.msk.bf16.vlgmr.msra.gmra.mrb[36].mxu0 %vm409_vm2, %v1698_v5 }
0x12f7   : > { %2273 = vmatpush3.xpose.msk.msra.mxu0 %vm409_vm2, %v1795_v6  ;;  %2274 = vmatprep.mubr.msk.f32.mxu0 %vm2357_vm1, %v2356_v8 }
0x12f8   : > { %2283 = vmatprep.subr.bf16.mxu0 %v2356_v8 }
0x12fe   : > { %2275 = vmatmul.mubr.msk.f32.vlgmr.msra.gmra.mrb[34].mxu0 %vm409_vm2, %v1793_v10 }
0x12ff   : > { %2284 = vmatpush3.bf16.msra.mxu0 %v2598_v19  ;;  %2285 = vmatprep.mubr.msk.bf16.mxu0 %vm2357_vm1, %v2356_v8 }
0x13c9   : > { %v1741_v11 = vpop.f32.mrb[36].mxu0 }
0x13ca   : > { %v1747_v12 = vpack.c.bf16 %v1741_v11, %v1741_v11  ;;  %v2264_v13 = vpop.f32.mrb[37].mxu0 }
0x13cb   : > { %v1744_v14 = vpop.f32.mrb[38].mxu0 }
0x13cc   : > { %v2265_v15 = vpop.f32.mrb[39].mxu0  ;;  %2269 = vmatmul.mubr.msk.bf16.vlgmr.msra.gmra.mrb[36].mxu1 %vm409_vm2, %v1747_v12 }
0x13cd   : > { %2279 = vmatprep.mubr.msk.bf16.mxu1 %vm2357_vm1, %v2356_v8 }
0x13d1   : > { %v1866_v16 = vpop.f32.mrb[34].mxu0 }
0x13d2   : > { %v1870_v17 = vmul.f32 0.35355338, %v1866_v16  ;;  %v2276_v41 = vpop.f32.mrb[35].mxu0 }
0x13d4   : > { %v1871_v7 = vsel %vm2484_vm3, -1e+30, %v1870_v17 }
0x13d5   : > { %v1872_v19 = vsel %vm409_vm2, %v1871_v7, -inf }
0x13d6   : > { %1873 = vmax.xlane.f32.xlu0 %v1872_v19 }
0x13ec   : > { %1884 = vrot.lane.b32.xlu0 %v2656_v18, %s2368_s16 }
0x1463   : > { %v1874_v21 = vpop.xlane.xlu0 %1873 }
0x1464   : > { %v1875_v22 = vsub.f32 %v1871_v7, %v1874_v21 }
0x1466   : > { %v1876_v23 = vmul.f32 1.442695, %v1875_v22 }
0x1467   : > { %v1885_v24 = vpop.permute.xlu0 %1884 }
0x1468   : > { %2344 = vpow2.f32 %v1876_v23  ;;  %v1890_v25 = vsel %vm505_vm4, %v1885_v24, 0 }
0x1469   : > { %2278 = vmatpush3.bf16.msra.mxu1 %v1890_v25 }
0x1472   : > { %v2345_v8 = vpop.eup %2344 }
0x1473   : > { %v1878_v26 = vsel %vm409_vm2, %v2345_v8, 0.0 }
0x1474   : > { %1879 = vadd.xlane.f32.xlu1 %v1878_v26 }
0x149f   : > { %v1785_v31 = vpop.f32.mrb[36].mxu1 }
0x14a0   : > { %v1791_v27 = vadd.f32 %v1785_v31, %v2693_v48  ;;  %v2270_v28 = vpop.f32.mrb[37].mxu1 }
0x14a1   : > { %v1788_v29 = vpop.f32.mrb[38].mxu1 }
0x14a2   : > { %v2271_v30 = vpop.f32.mrb[39].mxu1 }
0x1501   : > { %v1880_v33 = vpop.xlane.xlu1 %1879 }
0x1502   : > { %2346 = vrcp.f32 %v1880_v33 }
0x150c   : > { %v2347_v18 = vpop.eup %2346 }
0x150d   : > { %v1882_v34 = vmul.f32 %v2347_v18, %v2345_v8 }
0x150f   : > { %v1883_v35 = vpack.c.bf16 %v1882_v34, %v1882_v34 }
0x1511   : > { %2280 = vmatmul.mubr.msk.bf16.vlgmr.msra.gmra.mrb[40].mxu1 %vm409_vm2, %v1883_v35 }
0x15e4   : > { %v1926_v36 = vpop.f32.mrb[40].mxu1 }
0x15e5   : > { %v1932_v2 = vpack.c.bf16 %v1926_v36, %v1926_v36  ;;  %v2281_v37 = vpop.f32.mrb[41].mxu1 }
0x15e6   : > { %v1929_v38 = vpop.f32.mrb[42].mxu1 }
0x15e7   : > { %v2282_v4 = vpop.f32.mrb[43].mxu1  ;;  %2286 = vmatmul.mubr.msk.bf16.vlgmr.msra.gmra.mrb[40].mxu0 %vm409_vm2, %v1932_v2 }
0x16ba   : > { %v1970_v39 = vpop.f32.mrb[40].mxu0 }
0x16bb   : > { %v1976_v40 = vadd.f32 %v1970_v39, %v1791_v27  ;;  %v2287_v42 = vpop.f32.mrb[41].mxu0 }
0x16bc   : > { %v1973_v43 = vpop.f32.mrb[42].mxu0 }
0x16bd   : > { %v1977_v0 = vadd.f32 %v2608_v9, %v1976_v40  ;;  %v2288_v44 = vpop.f32.mrb[43].mxu0 }
0x16bf   : > { %v1978_v45 = vadd.f32 %v1977_v0, %v2612_v32 }
0x16c1   : > { %1979 = vst.msk [vmem:[%s300_s21] sm:$0xff] %vm321_vm0, %v1978_v45 }
0x16c2 PF: > { %s18_s27 = sadd.s32 1, %s2354_s27  }
0x16c3   : > { %p15_p4 = scmp.ge.s32.totalorder %s18_s27, 4  }
0x16c5   :  { %17 = sbr.rel (!%p15_p4) target bundleno = 1 (0x1), region = 82 }

</bundles_post_ra>
